<compile_context>
chip_gen: v7x
topology: tpu7x:2x2x1
jax: 0.10.0
libtpu: 0.0.40
codegen_flags: <defaults>
</compile_context>

<pallas_src>
import functools
import math

import jax
import jax.numpy as jnp
import numpy as np
from jax.experimental import pallas as pl
from jax.experimental.pallas import tpu as pltpu

_LANE = 128      # lane width -> channel padding granularity
_SUBLANE = 8


def _round_up(v, m):
    return (v + m - 1) // m * m


def _vmem_limit_bytes():
    """Generation-aware scoped-VMEM limit (v7x: 64 MiB physical, v5e/v6e: 128 MiB)."""
    try:
        cap = pltpu.get_tpu_info().vmem_capacity_bytes
    except Exception:
        cap = 64 * 1024 * 1024
    return int(min(cap * 3 // 4, 96 * 1024 * 1024))


def _pick_m_tile(M, io_bytes_per_row, resident_bytes, vlim, requested=None):
    """Largest 128-aligned M-tile whose pipeline footprint fits the VMEM budget.

    io_bytes_per_row must already include the double-buffering factor and the f32
    accumulator; resident_bytes covers weights/biases held at a constant block index.
    """
    if requested is not None:
        tm = min(int(requested), M)
    else:
        budget = max(vlim - resident_bytes - (6 << 20), 2 << 20)  # Mosaic scratch headroom
        tm = 4096
        while tm > _LANE and tm * io_bytes_per_row > budget:
            tm //= 2
        tm = min(tm, M)
    if tm < M:
        # 128-aligned tiles: bf16 packs 16 rows/vreg and the MXU wants full panels.
        tm = max(_LANE, (tm // _LANE) * _LANE)
    return tm


# ----------------------------------------------------------------------------
# Kernel 1: 1x1 conv == matmul over channels, fused bias (+ optional ReLU).
# ----------------------------------------------------------------------------
def _conv1x1_kernel(x_ref, w_ref, b_ref, o_ref, *, relu):
    acc = jnp.dot(x_ref[...], w_ref[...], preferred_element_type=jnp.float32)
    acc = acc + b_ref[...].astype(jnp.float32)
    if relu:
        acc = jnp.maximum(acc, 0.0)
    o_ref[...] = acc.astype(o_ref.dtype)


def conv1x1(xm, w, b, *, relu, m_tile=None):
    """xm: (M, Cin) panel, w: (Cin, Cout), b: (Cout,).  Returns (M, Cout)."""
    M, Cin = xm.shape
    Cout = w.shape[1]
    esz = xm.dtype.itemsize
    vlim = _vmem_limit_bytes()
    io_row = 2 * (Cin + Cout) * esz + Cout * 4           # dbl-buffered in/out + f32 acc
    resident = (Cin * Cout + Cout) * esz
    tm = _pick_m_tile(M, io_row, resident, vlim, m_tile)
    return pl.pallas_call(
        functools.partial(_conv1x1_kernel, relu=relu),
        out_shape=jax.ShapeDtypeStruct((M, Cout), xm.dtype),
        grid=(pl.cdiv(M, tm),),
        in_specs=[
            pl.BlockSpec((tm, Cin), lambda i: (i, 0)),
            pl.BlockSpec((Cin, Cout), lambda i: (0, 0)),   # resident (constant index)
            pl.BlockSpec((1, Cout), lambda i: (0, 0)),
        ],
        out_specs=pl.BlockSpec((tm, Cout), lambda i: (i, 0)),
        compiler_params=pltpu.CompilerParams(
            dimension_semantics=("parallel",),
            vmem_limit_bytes=vlim,
        ),
    )(xm, w, b.reshape(1, Cout))


# ----------------------------------------------------------------------------
# Kernel 2: fused [final 1x1 conv + bias + ReLU] + [shortcut 1x1 conv + bias] + add.
# ----------------------------------------------------------------------------
def _conv1x1_fused_kernel(h_ref, w3_ref, b3_ref, x_ref, wsc_ref, bsc_ref, o_ref):
    main = jnp.dot(h_ref[...], w3_ref[...], preferred_element_type=jnp.float32)
    main = jnp.maximum(main + b3_ref[...].astype(jnp.float32), 0.0)
    sc = jnp.dot(x_ref[...], wsc_ref[...], preferred_element_type=jnp.float32)
    sc = sc + bsc_ref[...].astype(jnp.float32)
    o_ref[...] = (main + sc).astype(o_ref.dtype)


def conv1x1_fused_residual(hm, w3, b3, xm, wsc, bsc, *, m_tile=None):
    M, Cmid = hm.shape
    Cin = xm.shape[1]
    Cout = w3.shape[1]
    assert xm.shape[0] == M
    esz = hm.dtype.itemsize
    vlim = _vmem_limit_bytes()
    io_row = 2 * (Cmid + Cin + Cout) * esz + 2 * Cout * 4
    resident = ((Cmid + Cin) * Cout + 2 * Cout) * esz
    tm = _pick_m_tile(M, io_row, resident, vlim, m_tile)
    return pl.pallas_call(
        _conv1x1_fused_kernel,
        out_shape=jax.ShapeDtypeStruct((M, Cout), hm.dtype),
        grid=(pl.cdiv(M, tm),),
        in_specs=[
            pl.BlockSpec((tm, Cmid), lambda i: (i, 0)),
            pl.BlockSpec((Cmid, Cout), lambda i: (0, 0)),
            pl.BlockSpec((1, Cout), lambda i: (0, 0)),
            pl.BlockSpec((tm, Cin), lambda i: (i, 0)),
            pl.BlockSpec((Cin, Cout), lambda i: (0, 0)),
            pl.BlockSpec((1, Cout), lambda i: (0, 0)),
        ],
        out_specs=pl.BlockSpec((tm, Cout), lambda i: (i, 0)),
        compiler_params=pltpu.CompilerParams(
            dimension_semantics=("parallel",),
            vmem_limit_bytes=vlim,
        ),
    )(hm, w3, b3.reshape(1, Cout), xm, wsc, bsc.reshape(1, Cout))


# ----------------------------------------------------------------------------
# Kernel 3: 3x3 conv (stride 1, pad 1) + bias + ReLU, row-band tiled.
# Grid = (image, row-band).  Per step: assemble a (TH+3)-padded-row band in VMEM
# (band block + three 1-row halo blocks), run 9 shifted-slab matmuls accumulated
# in f32 (acc initialised from tap 0), and store a lane-dense (TH, W, Cout) block.
# ----------------------------------------------------------------------------
def _conv3x3_kernel(a_ref, h0_ref, h1_ref, h2_ref, w_ref, b_ref, o_ref, xs_ref,
                    *, wp, th, w_out):
    rows_out = th * wp
    # Assemble the band (TH padded rows) + 3 halo rows into the flat scratch.
    av = a_ref[...]
    xs_ref[pl.ds(0, rows_out), :] = av
    xs_ref[pl.ds(rows_out, wp), :] = h0_ref[0]
    xs_ref[pl.ds(rows_out + wp, wp), :] = h1_ref[0]
    xs_ref[pl.ds(rows_out + 2 * wp, wp), :] = h2_ref[0]

    # Tap (kh, kw) contributes xs[m + kh*wp + kw, :] @ w[kh*3+kw] to output row m.
    acc = jnp.dot(av, w_ref[0], preferred_element_type=jnp.float32)   # tap (0,0) inits acc
    for k in range(1, 9):
        kh, kw = divmod(k, 3)
        off = kh * wp + kw                                            # static per unrolled tap
        acc = acc + jnp.dot(xs_ref[pl.ds(off, rows_out), :], w_ref[k],
                            preferred_element_type=jnp.float32)

    accv = jnp.maximum(acc + b_ref[...].astype(jnp.float32), 0.0).astype(o_ref.dtype)
    # Lane-dense exact-W store: drop the 2 junk columns per row inside the kernel.
    for i in range(th):
        o_ref[i, :, :] = accv[i * wp:i * wp + w_out, :]


def _pick_row_band(H, wp, cin, cout, vlim, requested=None):
    """Row-band height TH: multiple of 8//gcd(wp,8) (keeps TH*wp 8-aligned), VMEM-fit."""
    step = 8 // math.gcd(wp, 8)
    max_th = _round_up(H, step)
    if requested is not None:
        return max(step, _round_up(min(int(requested), max_th), step))
    per_row = wp * (2 * cin * 2 + cin * 2 + cout * 4) + 2 * wp * cout * 2
    resident = 9 * cin * cout * 2 + cout * 2 + 3 * wp * cin * 2 * 2
    budget = max(vlim - resident - (6 << 20), 2 << 20)
    th = min(max_th, _round_up(64, step))        # cap: keeps epilogue unroll + bands sane
    while th > step and th * per_row > budget:
        th = max(step, _round_up(th // 2, step))
    return th


def conv3x3_relu(x_nhwc, w_hwio, b, *, row_band=None):
    """3x3 conv, stride 1, padding 1, + bias + ReLU (channels already lane-padded)."""
    N, H, W, Cin = x_nhwc.shape
    Cout = w_hwio.shape[-1]
    wp = W + 2                       # padded width (2 junk columns per row in the matmul M dim)
    hp = H + 3                       # 1 top + 2 bottom pad rows keep all tap slices in-bounds
    # TODO(synk): fold this pad into the producing 1x1 kernel's output layout.
    xp = jnp.pad(x_nhwc, ((0, 0), (1, 2), (1, 1), (0, 0)))            # (N, hp, wp, Cin)
    xflat = xp.reshape(N, hp * wp, Cin)                               # contiguous, free
    w9 = w_hwio.reshape(9, Cin, Cout)

    vlim = _vmem_limit_bytes()
    th = _pick_row_band(H, wp, Cin, Cout, vlim, row_band)
    nb = pl.cdiv(H, th)
    rows_in_blk = th * wp
    assert rows_in_blk % _SUBLANE == 0

    def _halo_spec(j):
        # One padded image row just below the band; clamped index keeps edge blocks
        # in-bounds (clamped rows are only ever used by junk/masked outputs).
        return pl.BlockSpec(
            (None, 1, wp, Cin),
            lambda n, bb, j=j: (n, jnp.minimum(bb * th + th + j, hp - 1), 0, 0))

    return pl.pallas_call(
        functools.partial(_conv3x3_kernel, wp=wp, th=th, w_out=W),
        out_shape=jax.ShapeDtypeStruct((N, H, W, Cout), x_nhwc.dtype),
        grid=(N, nb),
        in_specs=[
            pl.BlockSpec((None, rows_in_blk, Cin), lambda n, bb: (n, bb, 0)),
            _halo_spec(0), _halo_spec(1), _halo_spec(2),
            pl.BlockSpec((9, Cin, Cout), lambda n, bb: (0, 0, 0)),    # resident weights
            pl.BlockSpec((1, Cout), lambda n, bb: (0, 0)),
        ],
        out_specs=pl.BlockSpec((None, th, W, Cout), lambda n, bb: (n, bb, 0, 0)),
        scratch_shapes=[
            pltpu.VMEM((_round_up((th + 3) * wp, _SUBLANE), Cin), x_nhwc.dtype),
        ],
        compiler_params=pltpu.CompilerParams(
            dimension_semantics=("parallel", "parallel"),
            vmem_limit_bytes=vlim,
        ),
    )(xflat, xp, xp, xp, w9, b.reshape(1, Cout))


# ----------------------------------------------------------------------------
# BottleNeck module (deterministic synthetic parameters).
# ----------------------------------------------------------------------------
def init_bottleneck_params(key, in_dim, mid_dim, out_dim, down=False):
    ks = jax.random.split(key, 10)
    rnd = lambda k, shape: jax.random.normal(k, shape, jnp.float32) * 0.1
    p = {
        "w1": rnd(ks[0], (in_dim, mid_dim)),        "b1": rnd(ks[1], (mid_dim,)),
        "w2": rnd(ks[2], (3, 3, mid_dim, mid_dim)), "b2": rnd(ks[3], (mid_dim,)),
        "w3": rnd(ks[4], (mid_dim, out_dim)),       "b3": rnd(ks[5], (out_dim,)),
    }
    if down:
        p["wd"] = rnd(ks[6], (in_dim, out_dim)); p["bd"] = rnd(ks[7], (out_dim,))
    else:
        p["we"] = rnd(ks[8], (in_dim, out_dim)); p["be"] = rnd(ks[9], (out_dim,))
    return p


def _pad_channels(a, c_to):
    c = a.shape[-1]
    if c == c_to:
        return a
    return jnp.pad(a, [(0, 0)] * (a.ndim - 1) + [(0, c_to - c)])


def _pad_matrix(w, rows_to, cols_to):
    r, c = w.shape
    return jnp.pad(w, ((0, rows_to - r), (0, cols_to - c)))


def bottleneck_forward(x_nchw, p, *, down=False, m_tile=None, row_band=None,
                       compute_dtype=jnp.bfloat16):
    N, in_dim, H, W = x_nchw.shape
    mid_dim = p["w1"].shape[1]
    out_dim = p["w3"].shape[1]
    in_p, mid_p, out_p = (_round_up(d, _LANE) for d in (in_dim, mid_dim, out_dim))
    cd = compute_dtype

    # layout glue (XLA side): NCHW -> NHWC, bf16, lane-pad channels
    x = _pad_channels(jnp.transpose(x_nchw, (0, 2, 3, 1)).astype(cd), in_p)

    if down:
        x = x[:, ::2, ::2, :]            # 1x1 stride-2 == subsample (matches PyTorch for odd dims too)
        Ho, Wo = x.shape[1], x.shape[2]
        wsc, bsc = p["wd"], p["bd"]
    else:
        Ho, Wo = H, W
        # NOTE: PyTorch's `x.size() is not out.size()` is always True -> dim_equalizer
        # is ALWAYS applied on the non-down path.
        wsc, bsc = p["we"], p["be"]

    M = N * Ho * Wo
    xm = x.reshape(M, in_p)

    w1 = _pad_matrix(p["w1"], in_p, mid_p).astype(cd)
    b1 = _pad_channels(p["b1"], mid_p).astype(cd)
    w2 = jnp.pad(p["w2"], ((0, 0), (0, 0),
                           (0, mid_p - mid_dim), (0, mid_p - mid_dim))).astype(cd)
    b2 = _pad_channels(p["b2"], mid_p).astype(cd)
    w3 = _pad_matrix(p["w3"], mid_p, out_p).astype(cd)
    b3 = _pad_channels(p["b3"], out_p).astype(cd)
    wsc = _pad_matrix(wsc, in_p, out_p).astype(cd)
    bsc = _pad_channels(bsc, out_p).astype(cd)

    h1 = conv1x1(xm, w1, b1, relu=True, m_tile=m_tile)                   # (M, mid_p)
    h2 = conv3x3_relu(h1.reshape(N, Ho, Wo, mid_p), w2, b2,
                      row_band=row_band)                                 # (N, Ho, Wo, mid_p)
    out = conv1x1_fused_residual(h2.reshape(M, mid_p), w3, b3,
                                 xm, wsc, bsc, m_tile=m_tile)            # (M, out_p)

    out = out.reshape(N, Ho, Wo, out_p)[:, :, :, :out_dim]
    return jnp.transpose(out, (0, 3, 1, 2)).astype(jnp.float32)          # NHWC -> NCHW


# ----------------------------------------------------------------------------
# Pure-JAX reference (lax.conv) for a correctness sanity check.
# ----------------------------------------------------------------------------
def _ref_conv(x, w4, b, stride, pad):
    y = jax.lax.conv_general_dilated(
        x, w4, (stride, stride), ((pad, pad), (pad, pad)),
        dimension_numbers=("NHWC", "HWIO", "NHWC"))
    return y + b


def bottleneck_ref(x_nchw, p, *, down=False):
    x = jnp.transpose(x_nchw, (0, 2, 3, 1))
    s = 2 if down else 1
    relu = lambda v: jnp.maximum(v, 0.0)
    h = relu(_ref_conv(x, p["w1"][None, None], p["b1"], s, 0))
    h = relu(_ref_conv(h, p["w2"], p["b2"], 1, 1))
    h = relu(_ref_conv(h, p["w3"][None, None], p["b3"], 1, 0))
    if down:
        sc = _ref_conv(x, p["wd"][None, None], p["bd"], 2, 0)
    else:
        sc = _ref_conv(x, p["we"][None, None], p["be"], 1, 0)
    return jnp.transpose(h + sc, (0, 3, 1, 2))


if __name__ == "__main__":
    key = jax.random.PRNGKey(0)
    k_x, k_p1, k_p2 = jax.random.split(key, 3)

    N, in_dim, mid_dim, out_dim, H, W = 2, 8, 4, 16, 16, 16
    x = jax.random.normal(k_x, (N, in_dim, H, W), jnp.float32)           # NCHW input

    # reference sees the same bf16-rounded params/input the kernels consume
    bf16_rt = lambda t: jax.tree_util.tree_map(
        lambda a: a.astype(jnp.bfloat16).astype(jnp.float32), t)

    # --- non-down BottleNeck (m_tile=256 / row_band=4 exercise multi-step grids) ---
    p = init_bottleneck_params(k_p1, in_dim, mid_dim, out_dim, down=False)
    fwd = jax.jit(functools.partial(bottleneck_forward, down=False,
                                    m_tile=256, row_band=4))
    y = jax.block_until_ready(fwd(x, p))
    assert y.shape == (N, out_dim, H, W)
    y_ref = bottleneck_ref(bf16_rt(x), bf16_rt(p), down=False)
    np.testing.assert_allclose(np.asarray(y), np.asarray(y_ref), rtol=2e-2, atol=2e-2)

    # --- down (stride-2) BottleNeck ---
    pd = init_bottleneck_params(k_p2, in_dim, mid_dim, out_dim, down=True)
    fwd_d = jax.jit(functools.partial(bottleneck_forward, down=True,
                                      m_tile=256, row_band=4))
    yd = jax.block_until_ready(fwd_d(x, pd))
    assert yd.shape == (N, out_dim, H // 2, W // 2)
    yd_ref = bottleneck_ref(bf16_rt(x), bf16_rt(pd), down=True)
    np.testing.assert_allclose(np.asarray(yd), np.asarray(yd_ref), rtol=2e-2, atol=2e-2)

    print("KERNEL_OK")
</pallas_src>

<mosaic_0001>
module attributes {stable_mosaic.version = 11 : i64} {
  func.func @_conv1x1_kernel(%arg0: i32, %arg1: memref<256x128xbf16, #tpu.memory_space<vmem>>, %arg2: memref<128x128xbf16, #tpu.memory_space<vmem>>, %arg3: memref<1x128xbf16, #tpu.memory_space<vmem>>, %arg4: memref<256x128xbf16, #tpu.memory_space<vmem>>) attributes {dimension_semantics = [#tpu.dimension_semantics<parallel>], iteration_bounds = array<i64: 2>, scalar_prefetch = 0 : i64, scratch_operands = 0 : i64, tpu.core_type = #tpu.core_type<tc>, window_params = [{transform_indices = @transform_0, window_bounds = array<i64: 256, 128>}, {pipeline_mode = #tpu.pipeline_mode<synchronous>, transform_indices = @transform_1, window_bounds = array<i64: 128, 128>}, {pipeline_mode = #tpu.pipeline_mode<synchronous>, transform_indices = @transform_2, window_bounds = array<i64: 1, 128>}, {transform_indices = @transform_3, window_bounds = array<i64: 256, 128>}]} {
    %c0 = arith.constant 0 : index
    %c0_0 = arith.constant 0 : index
    %0 = vector.load %arg1[%c0, %c0_0] : memref<256x128xbf16, #tpu.memory_space<vmem>>, vector<256x128xbf16>
    %c0_1 = arith.constant 0 : index
    %c0_2 = arith.constant 0 : index
    %1 = vector.load %arg2[%c0_1, %c0_2] : memref<128x128xbf16, #tpu.memory_space<vmem>>, vector<128x128xbf16>
    %cst = arith.constant dense<0.000000e+00> : vector<256x128xf32>
    %2 = tpu.matmul %0, %1, %cst {dimension_numbers = #tpu.dot_dimension_numbers<[1], [0], [0], [1], [0, 0, 1, 1], [], []>} : vector<256x128xbf16>, vector<128x128xbf16>, vector<256x128xf32> -> vector<256x128xf32>
    %c0_3 = arith.constant 0 : index
    %c0_4 = arith.constant 0 : index
    %3 = vector.load %arg3[%c0_3, %c0_4] : memref<1x128xbf16, #tpu.memory_space<vmem>>, vector<1x128xbf16>
    %4 = arith.extf %3 : vector<1x128xbf16> to vector<1x128xf32>
    %5 = vector.broadcast %4 : vector<1x128xf32> to vector<256x128xf32>
    %6 = arith.addf %2, %5 : vector<256x128xf32>
    %cst_5 = arith.constant 0.000000e+00 : f32
    %7 = vector.broadcast %cst_5 : f32 to vector<256x128xf32>
    %8 = arith.maximumf %6, %7 : vector<256x128xf32>
    %9 = arith.truncf %8 : vector<256x128xf32> to vector<256x128xbf16>
    %c0_6 = arith.constant 0 : index
    %c0_7 = arith.constant 0 : index
    %10 = vector.load %arg4[%c0_6, %c0_7] : memref<256x128xbf16, #tpu.memory_space<vmem>>, vector<256x128xbf16>
    tpu.vector_store %arg4[%c0_6, %c0_7], %9 {strides = array<i32>} : memref<256x128xbf16, #tpu.memory_space<vmem>>, vector<256x128xbf16>,
    return
  }
  func.func @transform_0(%arg0: i32) -> (i32, i32) {
    %c0_i32 = arith.constant 0 : i32
    %c0_i32_0 = arith.constant 0 : i32
    return %arg0, %c0_i32 : i32, i32
  }
  func.func @transform_1(%arg0: i32) -> (i32, i32) {
    %c0_i32 = arith.constant 0 : i32
    %c0_i32_0 = arith.constant 0 : i32
    %c0_i32_1 = arith.constant 0 : i32
    return %c0_i32, %c0_i32_0 : i32, i32
  }
  func.func @transform_2(%arg0: i32) -> (i32, i32) {
    %c0_i32 = arith.constant 0 : i32
    %c0_i32_0 = arith.constant 0 : i32
    %c0_i32_1 = arith.constant 0 : i32
    return %c0_i32, %c0_i32_0 : i32, i32
  }
  func.func @transform_3(%arg0: i32) -> (i32, i32) {
    %c0_i32 = arith.constant 0 : i32
    %c0_i32_0 = arith.constant 0 : i32
    return %arg0, %c0_i32 : i32, i32
  }
}

module attributes {stable_mosaic.version = 11 : i64} {
  func.func @_conv3x3_kernel(%arg0: i32, %arg1: i32, %arg2: memref<1x72x128xbf16, #tpu.memory_space<vmem>>, %arg3: memref<1x1x18x128xbf16, #tpu.memory_space<vmem>>, %arg4: memref<1x1x18x128xbf16, #tpu.memory_space<vmem>>, %arg5: memref<1x1x18x128xbf16, #tpu.memory_space<vmem>>, %arg6: memref<9x128x128xbf16, #tpu.memory_space<vmem>>, %arg7: memref<1x128xbf16, #tpu.memory_space<vmem>>, %arg8: memref<1x4x16x128xbf16, #tpu.memory_space<vmem>>, %arg9: memref<128x128xbf16, #tpu.memory_space<vmem>>) attributes {dimension_semantics = [#tpu.dimension_semantics<parallel>, #tpu.dimension_semantics<parallel>], iteration_bounds = array<i64: 2, 4>, scalar_prefetch = 0 : i64, scratch_operands = 1 : i64, tpu.core_type = #tpu.core_type<tc>, window_params = [{transform_indices = @transform_0, window_bounds = array<i64: 1, 72, 128>}, {transform_indices = @transform_1, window_bounds = array<i64: 1, 1, 18, 128>}, {transform_indices = @transform_2, window_bounds = array<i64: 1, 1, 18, 128>}, {transform_indices = @transform_3, window_bounds = array<i64: 1, 1, 18, 128>}, {pipeline_mode = #tpu.pipeline_mode<synchronous>, transform_indices = @transform_4, window_bounds = array<i64: 9, 128, 128>}, {pipeline_mode = #tpu.pipeline_mode<synchronous>, transform_indices = @transform_5, window_bounds = array<i64: 1, 128>}, {transform_indices = @transform_6, window_bounds = array<i64: 1, 4, 16, 128>}]} {
    %c0 = arith.constant 0 : index
    %c0_0 = arith.constant 0 : index
    %c0_1 = arith.constant 0 : index
    %0 = vector.load %arg2[%c0, %c0_0, %c0_1] : memref<1x72x128xbf16, #tpu.memory_space<vmem>>, vector<1x72x128xbf16>
    %1 = vector.shape_cast %0 : vector<1x72x128xbf16> to vector<72x128xbf16>
    %c0_2 = arith.constant 0 : index
    %c0_3 = arith.constant 0 : index
    %2 = vector.load %arg9[%c0_2, %c0_3] : memref<128x128xbf16, #tpu.memory_space<vmem>>, vector<72x128xbf16>
    tpu.vector_store %arg9[%c0_2, %c0_3], %1 {strides = array<i32>} : memref<128x128xbf16, #tpu.memory_space<vmem>>, vector<72x128xbf16>,
    %c0_4 = arith.constant 0 : index
    %c0_5 = arith.constant 0 : index
    %c0_6 = arith.constant 0 : index
    %c0_7 = arith.constant 0 : index
    %3 = vector.load %arg3[%c0_4, %c0_5, %c0_6, %c0_7] : memref<1x1x18x128xbf16, #tpu.memory_space<vmem>>, vector<1x1x18x128xbf16>
    %4 = vector.shape_cast %3 : vector<1x1x18x128xbf16> to vector<18x128xbf16>
    %c72 = arith.constant 72 : index
    %c0_8 = arith.constant 0 : index
    %5 = vector.load %arg9[%c72, %c0_8] : memref<128x128xbf16, #tpu.memory_space<vmem>>, vector<18x128xbf16>
    tpu.vector_store %arg9[%c72, %c0_8], %4 {strides = array<i32>} : memref<128x128xbf16, #tpu.memory_space<vmem>>, vector<18x128xbf16>,
    %c0_9 = arith.constant 0 : index
    %c0_10 = arith.constant 0 : index
    %c0_11 = arith.constant 0 : index
    %c0_12 = arith.constant 0 : index
    %6 = vector.load %arg4[%c0_9, %c0_10, %c0_11, %c0_12] : memref<1x1x18x128xbf16, #tpu.memory_space<vmem>>, vector<1x1x18x128xbf16>
    %7 = vector.shape_cast %6 : vector<1x1x18x128xbf16> to vector<18x128xbf16>
    %c90 = arith.constant 90 : index
    %c0_13 = arith.constant 0 : index
    %8 = vector.load %arg9[%c90, %c0_13] : memref<128x128xbf16, #tpu.memory_space<vmem>>, vector<18x128xbf16>
    tpu.vector_store %arg9[%c90, %c0_13], %7 {strides = array<i32>} : memref<128x128xbf16, #tpu.memory_space<vmem>>, vector<18x128xbf16>,
    %c0_14 = arith.constant 0 : index
    %c0_15 = arith.constant 0 : index
    %c0_16 = arith.constant 0 : index
    %c0_17 = arith.constant 0 : index
    %9 = vector.load %arg5[%c0_14, %c0_15, %c0_16, %c0_17] : memref<1x1x18x128xbf16, #tpu.memory_space<vmem>>, vector<1x1x18x128xbf16>
    %10 = vector.shape_cast %9 : vector<1x1x18x128xbf16> to vector<18x128xbf16>
    %c108 = arith.constant 108 : index
    %c0_18 = arith.constant 0 : index
    %11 = vector.load %arg9[%c108, %c0_18] : memref<128x128xbf16, #tpu.memory_space<vmem>>, vector<18x128xbf16>
    tpu.vector_store %arg9[%c108, %c0_18], %10 {strides = array<i32>} : memref<128x128xbf16, #tpu.memory_space<vmem>>, vector<18x128xbf16>,
    %c0_19 = arith.constant 0 : index
    %c0_20 = arith.constant 0 : index
    %c0_21 = arith.constant 0 : index
    %12 = vector.load %arg6[%c0_19, %c0_20, %c0_21] : memref<9x128x128xbf16, #tpu.memory_space<vmem>>, vector<1x128x128xbf16>
    %13 = vector.shape_cast %12 : vector<1x128x128xbf16> to vector<128x128xbf16>
    %cst = arith.constant dense<0.000000e+00> : vector<72x128xf32>
    %14 = tpu.matmul %1, %13, %cst {dimension_numbers = #tpu.dot_dimension_numbers<[1], [0], [0], [1], [0, 0, 1, 1], [], []>} : vector<72x128xbf16>, vector<128x128xbf16>, vector<72x128xf32> -> vector<72x128xf32>
    %c1 = arith.constant 1 : index
    %c0_22 = arith.constant 0 : index
    %15 = vector.load %arg9[%c1, %c0_22] : memref<128x128xbf16, #tpu.memory_space<vmem>>, vector<72x128xbf16>
    %c1_23 = arith.constant 1 : index
    %c0_24 = arith.constant 0 : index
    %c0_25 = arith.constant 0 : index
    %16 = vector.load %arg6[%c1_23, %c0_24, %c0_25] : memref<9x128x128xbf16, #tpu.memory_space<vmem>>, vector<1x128x128xbf16>
    %17 = vector.shape_cast %16 : vector<1x128x128xbf16> to vector<128x128xbf16>
    %cst_26 = arith.constant dense<0.000000e+00> : vector<72x128xf32>
    %18 = tpu.matmul %15, %17, %cst_26 {dimension_numbers = #tpu.dot_dimension_numbers<[1], [0], [0], [1], [0, 0, 1, 1], [], []>} : vector<72x128xbf16>, vector<128x128xbf16>, vector<72x128xf32> -> vector<72x128xf32>
    %19 = arith.addf %14, %18 : vector<72x128xf32>
    %c2 = arith.constant 2 : index
    %c0_27 = arith.constant 0 : index
    %20 = vector.load %arg9[%c2, %c0_27] : memref<128x128xbf16, #tpu.memory_space<vmem>>, vector<72x128xbf16>
    %c2_28 = arith.constant 2 : index
    %c0_29 = arith.constant 0 : index
    %c0_30 = arith.constant 0 : index
    %21 = vector.load %arg6[%c2_28, %c0_29, %c0_30] : memref<9x128x128xbf16, #tpu.memory_space<vmem>>, vector<1x128x128xbf16>
    %22 = vector.shape_cast %21 : vector<1x128x128xbf16> to vector<128x128xbf16>
    %cst_31 = arith.constant dense<0.000000e+00> : vector<72x128xf32>
    %23 = tpu.matmul %20, %22, %cst_31 {dimension_numbers = #tpu.dot_dimension_numbers<[1], [0], [0], [1], [0, 0, 1, 1], [], []>} : vector<72x128xbf16>, vector<128x128xbf16>, vector<72x128xf32> -> vector<72x128xf32>
    %24 = arith.addf %19, %23 : vector<72x128xf32>
    %c18 = arith.constant 18 : index
    %c0_32 = arith.constant 0 : index
    %25 = vector.load %arg9[%c18, %c0_32] : memref<128x128xbf16, #tpu.memory_space<vmem>>, vector<72x128xbf16>
    %c3 = arith.constant 3 : index
    %c0_33 = arith.constant 0 : index
    %c0_34 = arith.constant 0 : index
    %26 = vector.load %arg6[%c3, %c0_33, %c0_34] : memref<9x128x128xbf16, #tpu.memory_space<vmem>>, vector<1x128x128xbf16>
    %27 = vector.shape_cast %26 : vector<1x128x128xbf16> to vector<128x128xbf16>
    %cst_35 = arith.constant dense<0.000000e+00> : vector<72x128xf32>
    %28 = tpu.matmul %25, %27, %cst_35 {dimension_numbers = #tpu.dot_dimension_numbers<[1], [0], [0], [1], [0, 0, 1, 1], [], []>} : vector<72x128xbf16>, vector<128x128xbf16>, vector<72x128xf32> -> vector<72x128xf32>
    %29 = arith.addf %24, %28 : vector<72x128xf32>
    %c19 = arith.constant 19 : index
    %c0_36 = arith.constant 0 : index
    %30 = vector.load %arg9[%c19, %c0_36] : memref<128x128xbf16, #tpu.memory_space<vmem>>, vector<72x128xbf16>
    %c4 = arith.constant 4 : index
    %c0_37 = arith.constant 0 : index
    %c0_38 = arith.constant 0 : index
    %31 = vector.load %arg6[%c4, %c0_37, %c0_38] : memref<9x128x128xbf16, #tpu.memory_space<vmem>>, vector<1x128x128xbf16>
    %32 = vector.shape_cast %31 : vector<1x128x128xbf16> to vector<128x128xbf16>
    %cst_39 = arith.constant dense<0.000000e+00> : vector<72x128xf32>
    %33 = tpu.matmul %30, %32, %cst_39 {dimension_numbers = #tpu.dot_dimension_numbers<[1], [0], [0], [1], [0, 0, 1, 1], [], []>} : vector<72x128xbf16>, vector<128x128xbf16>, vector<72x128xf32> -> vector<72x128xf32>
    %34 = arith.addf %29, %33 : vector<72x128xf32>
    %c20 = arith.constant 20 : index
    %c0_40 = arith.constant 0 : index
    %35 = vector.load %arg9[%c20, %c0_40] : memref<128x128xbf16, #tpu.memory_space<vmem>>, vector<72x128xbf16>
    %c5 = arith.constant 5 : index
    %c0_41 = arith.constant 0 : index
    %c0_42 = arith.constant 0 : index
    %36 = vector.load %arg6[%c5, %c0_41, %c0_42] : memref<9x128x128xbf16, #tpu.memory_space<vmem>>, vector<1x128x128xbf16>
    %37 = vector.shape_cast %36 : vector<1x128x128xbf16> to vector<128x128xbf16>
    %cst_43 = arith.constant dense<0.000000e+00> : vector<72x128xf32>
    %38 = tpu.matmul %35, %37, %cst_43 {dimension_numbers = #tpu.dot_dimension_numbers<[1], [0], [0], [1], [0, 0, 1, 1], [], []>} : vector<72x128xbf16>, vector<128x128xbf16>, vector<72x128xf32> -> vector<72x128xf32>
    %39 = arith.addf %34, %38 : vector<72x128xf32>
    %c36 = arith.constant 36 : index
    %c0_44 = arith.constant 0 : index
    %40 = vector.load %arg9[%c36, %c0_44] : memref<128x128xbf16, #tpu.memory_space<vmem>>, vector<72x128xbf16>
    %c6 = arith.constant 6 : index
    %c0_45 = arith.constant 0 : index
    %c0_46 = arith.constant 0 : index
    %41 = vector.load %arg6[%c6, %c0_45, %c0_46] : memref<9x128x128xbf16, #tpu.memory_space<vmem>>, vector<1x128x128xbf16>
    %42 = vector.shape_cast %41 : vector<1x128x128xbf16> to vector<128x128xbf16>
    %cst_47 = arith.constant dense<0.000000e+00> : vector<72x128xf32>
    %43 = tpu.matmul %40, %42, %cst_47 {dimension_numbers = #tpu.dot_dimension_numbers<[1], [0], [0], [1], [0, 0, 1, 1], [], []>} : vector<72x128xbf16>, vector<128x128xbf16>, vector<72x128xf32> -> vector<72x128xf32>
    %44 = arith.addf %39, %43 : vector<72x128xf32>
    %c37 = arith.constant 37 : index
    %c0_48 = arith.constant 0 : index
    %45 = vector.load %arg9[%c37, %c0_48] : memref<128x128xbf16, #tpu.memory_space<vmem>>, vector<72x128xbf16>
    %c7 = arith.constant 7 : index
    %c0_49 = arith.constant 0 : index
    %c0_50 = arith.constant 0 : index
    %46 = vector.load %arg6[%c7, %c0_49, %c0_50] : memref<9x128x128xbf16, #tpu.memory_space<vmem>>, vector<1x128x128xbf16>
    %47 = vector.shape_cast %46 : vector<1x128x128xbf16> to vector<128x128xbf16>
    %cst_51 = arith.constant dense<0.000000e+00> : vector<72x128xf32>
    %48 = tpu.matmul %45, %47, %cst_51 {dimension_numbers = #tpu.dot_dimension_numbers<[1], [0], [0], [1], [0, 0, 1, 1], [], []>} : vector<72x128xbf16>, vector<128x128xbf16>, vector<72x128xf32> -> vector<72x128xf32>
    %49 = arith.addf %44, %48 : vector<72x128xf32>
    %c38 = arith.constant 38 : index
    %c0_52 = arith.constant 0 : index
    %50 = vector.load %arg9[%c38, %c0_52] : memref<128x128xbf16, #tpu.memory_space<vmem>>, vector<72x128xbf16>
    %c8 = arith.constant 8 : index
    %c0_53 = arith.constant 0 : index
    %c0_54 = arith.constant 0 : index
    %51 = vector.load %arg6[%c8, %c0_53, %c0_54] : memref<9x128x128xbf16, #tpu.memory_space<vmem>>, vector<1x128x128xbf16>
    %52 = vector.shape_cast %51 : vector<1x128x128xbf16> to vector<128x128xbf16>
    %cst_55 = arith.constant dense<0.000000e+00> : vector<72x128xf32>
    %53 = tpu.matmul %50, %52, %cst_55 {dimension_numbers = #tpu.dot_dimension_numbers<[1], [0], [0], [1], [0, 0, 1, 1], [], []>} : vector<72x128xbf16>, vector<128x128xbf16>, vector<72x128xf32> -> vector<72x128xf32>
    %54 = arith.addf %49, %53 : vector<72x128xf32>
    %c0_56 = arith.constant 0 : index
    %c0_57 = arith.constant 0 : index
    %55 = vector.load %arg7[%c0_56, %c0_57] : memref<1x128xbf16, #tpu.memory_space<vmem>>, vector<1x128xbf16>
    %56 = arith.extf %55 : vector<1x128xbf16> to vector<1x128xf32>
    %57 = vector.broadcast %56 : vector<1x128xf32> to vector<72x128xf32>
    %58 = arith.addf %54, %57 : vector<72x128xf32>
    %cst_58 = arith.constant 0.000000e+00 : f32
    %59 = vector.broadcast %cst_58 : f32 to vector<72x128xf32>
    %60 = arith.maximumf %58, %59 : vector<72x128xf32>
    %61 = arith.truncf %60 : vector<72x128xf32> to vector<72x128xbf16>
    %62 = vector.extract_strided_slice %61 {offsets = [0, 0], sizes = [16, 128], strides = [1, 1]} : vector<72x128xbf16> to vector<16x128xbf16>
    %c0_59 = arith.constant 0 : index
    %c0_60 = arith.constant 0 : index
    %c0_61 = arith.constant 0 : index
    %c0_62 = arith.constant 0 : index
    %63 = vector.load %arg8[%c0_59, %c0_60, %c0_61, %c0_62] : memref<1x4x16x128xbf16, #tpu.memory_space<vmem>>, vector<1x1x16x128xbf16>
    %64 = vector.shape_cast %63 : vector<1x1x16x128xbf16> to vector<16x128xbf16>
    %65 = vector.shape_cast %62 : vector<16x128xbf16> to vector<1x1x16x128xbf16>
    tpu.vector_store %arg8[%c0_59, %c0_60, %c0_61, %c0_62], %65 {strides = array<i32>} : memref<1x4x16x128xbf16, #tpu.memory_space<vmem>>, vector<1x1x16x128xbf16>,
    %66 = vector.extract_strided_slice %61 {offsets = [18, 0], sizes = [16, 128], strides = [1, 1]} : vector<72x128xbf16> to vector<16x128xbf16>
    %c0_63 = arith.constant 0 : index
    %c1_64 = arith.constant 1 : index
    %c0_65 = arith.constant 0 : index
    %c0_66 = arith.constant 0 : index
    %67 = vector.load %arg8[%c0_63, %c1_64, %c0_65, %c0_66] : memref<1x4x16x128xbf16, #tpu.memory_space<vmem>>, vector<1x1x16x128xbf16>
    %68 = vector.shape_cast %67 : vector<1x1x16x128xbf16> to vector<16x128xbf16>
    %69 = vector.shape_cast %66 : vector<16x128xbf16> to vector<1x1x16x128xbf16>
    tpu.vector_store %arg8[%c0_63, %c1_64, %c0_65, %c0_66], %69 {strides = array<i32>} : memref<1x4x16x128xbf16, #tpu.memory_space<vmem>>, vector<1x1x16x128xbf16>,
    %70 = vector.extract_strided_slice %61 {offsets = [36, 0], sizes = [16, 128], strides = [1, 1]} : vector<72x128xbf16> to vector<16x128xbf16>
    %c0_67 = arith.constant 0 : index
    %c2_68 = arith.constant 2 : index
    %c0_69 = arith.constant 0 : index
    %c0_70 = arith.constant 0 : index
    %71 = vector.load %arg8[%c0_67, %c2_68, %c0_69, %c0_70] : memref<1x4x16x128xbf16, #tpu.memory_space<vmem>>, vector<1x1x16x128xbf16>
    %72 = vector.shape_cast %71 : vector<1x1x16x128xbf16> to vector<16x128xbf16>
    %73 = vector.shape_cast %70 : vector<16x128xbf16> to vector<1x1x16x128xbf16>
    tpu.vector_store %arg8[%c0_67, %c2_68, %c0_69, %c0_70], %73 {strides = array<i32>} : memref<1x4x16x128xbf16, #tpu.memory_space<vmem>>, vector<1x1x16x128xbf16>,
    %74 = vector.extract_strided_slice %61 {offsets = [54, 0], sizes = [16, 128], strides = [1, 1]} : vector<72x128xbf16> to vector<16x128xbf16>
    %c0_71 = arith.constant 0 : index
    %c3_72 = arith.constant 3 : index
    %c0_73 = arith.constant 0 : index
    %c0_74 = arith.constant 0 : index
    %75 = vector.load %arg8[%c0_71, %c3_72, %c0_73, %c0_74] : memref<1x4x16x128xbf16, #tpu.memory_space<vmem>>, vector<1x1x16x128xbf16>
    %76 = vector.shape_cast %75 : vector<1x1x16x128xbf16> to vector<16x128xbf16>
    %77 = vector.shape_cast %74 : vector<16x128xbf16> to vector<1x1x16x128xbf16>
    tpu.vector_store %arg8[%c0_71, %c3_72, %c0_73, %c0_74], %77 {strides = array<i32>} : memref<1x4x16x128xbf16, #tpu.memory_space<vmem>>, vector<1x1x16x128xbf16>,
    return
  }
  func.func @transform_0(%arg0: i32, %arg1: i32) -> (i32, i32, i32) {
    %c0_i32 = arith.constant 0 : i32
    %c0_i32_0 = arith.constant 0 : i32
    return %arg0, %arg1, %c0_i32 : i32, i32, i32
  }
  func.func @transform_1(%arg0: i32, %arg1: i32) -> (i32, i32, i32, i32) {
    %c4_i32 = arith.constant 4 : i32
    %0 = arith.muli %arg1, %c4_i32 : i32
    %c4_i32_0 = arith.constant 4 : i32
    %1 = arith.addi %0, %c4_i32_0 : i32
    %c0_i32 = arith.constant 0 : i32
    %2 = arith.addi %1, %c0_i32 : i32
    %c18_i32 = arith.constant 18 : i32
    %3 = arith.minsi %2, %c18_i32 : i32
    %c0_i32_1 = arith.constant 0 : i32
    %c0_i32_2 = arith.constant 0 : i32
    %c0_i32_3 = arith.constant 0 : i32
    return %arg0, %3, %c0_i32_1, %c0_i32_2 : i32, i32, i32, i32
  }
  func.func @transform_2(%arg0: i32, %arg1: i32) -> (i32, i32, i32, i32) {
    %c4_i32 = arith.constant 4 : i32
    %0 = arith.muli %arg1, %c4_i32 : i32
    %c4_i32_0 = arith.constant 4 : i32
    %1 = arith.addi %0, %c4_i32_0 : i32
    %c1_i32 = arith.constant 1 : i32
    %2 = arith.addi %1, %c1_i32 : i32
    %c18_i32 = arith.constant 18 : i32
    %3 = arith.minsi %2, %c18_i32 : i32
    %c0_i32 = arith.constant 0 : i32
    %c0_i32_1 = arith.constant 0 : i32
    %c0_i32_2 = arith.constant 0 : i32
    return %arg0, %3, %c0_i32, %c0_i32_1 : i32, i32, i32, i32
  }
  func.func @transform_3(%arg0: i32, %arg1: i32) -> (i32, i32, i32, i32) {
    %c4_i32 = arith.constant 4 : i32
    %0 = arith.muli %arg1, %c4_i32 : i32
    %c4_i32_0 = arith.constant 4 : i32
    %1 = arith.addi %0, %c4_i32_0 : i32
    %c2_i32 = arith.constant 2 : i32
    %2 = arith.addi %1, %c2_i32 : i32
    %c18_i32 = arith.constant 18 : i32
    %3 = arith.minsi %2, %c18_i32 : i32
    %c0_i32 = arith.constant 0 : i32
    %c0_i32_1 = arith.constant 0 : i32
    %c0_i32_2 = arith.constant 0 : i32
    return %arg0, %3, %c0_i32, %c0_i32_1 : i32, i32, i32, i32
  }
  func.func @transform_4(%arg0: i32, %arg1: i32) -> (i32, i32, i32) {
    %c0_i32 = arith.constant 0 : i32
    %c0_i32_0 = arith.constant 0 : i32
    %c0_i32_1 = arith.constant 0 : i32
    %c0_i32_2 = arith.constant 0 : i32
    return %c0_i32, %c0_i32_0, %c0_i32_1 : i32, i32, i32
  }
  func.func @transform_5(%arg0: i32, %arg1: i32) -> (i32, i32) {
    %c0_i32 = arith.constant 0 : i32
    %c0_i32_0 = arith.constant 0 : i32
    %c0_i32_1 = arith.constant 0 : i32
    return %c0_i32, %c0_i32_0 : i32, i32
  }
  func.func @transform_6(%arg0: i32, %arg1: i32) -> (i32, i32, i32, i32) {
    %c0_i32 = arith.constant 0 : i32
    %c0_i32_0 = arith.constant 0 : i32
    %c0_i32_1 = arith.constant 0 : i32
    return %arg0, %arg1, %c0_i32, %c0_i32_0 : i32, i32, i32, i32
  }
}

module attributes {stable_mosaic.version = 11 : i64} {
  func.func @_conv1x1_fused_kernel(%arg0: i32, %arg1: memref<256x128xbf16, #tpu.memory_space<vmem>>, %arg2: memref<128x128xbf16, #tpu.memory_space<vmem>>, %arg3: memref<1x128xbf16, #tpu.memory_space<vmem>>, %arg4: memref<256x128xbf16, #tpu.memory_space<vmem>>, %arg5: memref<128x128xbf16, #tpu.memory_space<vmem>>, %arg6: memref<1x128xbf16, #tpu.memory_space<vmem>>, %arg7: memref<256x128xbf16, #tpu.memory_space<vmem>>) attributes {dimension_semantics = [#tpu.dimension_semantics<parallel>], iteration_bounds = array<i64: 2>, scalar_prefetch = 0 : i64, scratch_operands = 0 : i64, tpu.core_type = #tpu.core_type<tc>, window_params = [{transform_indices = @transform_0, window_bounds = array<i64: 256, 128>}, {pipeline_mode = #tpu.pipeline_mode<synchronous>, transform_indices = @transform_1, window_bounds = array<i64: 128, 128>}, {pipeline_mode = #tpu.pipeline_mode<synchronous>, transform_indices = @transform_2, window_bounds = array<i64: 1, 128>}, {transform_indices = @transform_3, window_bounds = array<i64: 256, 128>}, {pipeline_mode = #tpu.pipeline_mode<synchronous>, transform_indices = @transform_4, window_bounds = array<i64: 128, 128>}, {pipeline_mode = #tpu.pipeline_mode<synchronous>, transform_indices = @transform_5, window_bounds = array<i64: 1, 128>}, {transform_indices = @transform_6, window_bounds = array<i64: 256, 128>}]} {
    %c0 = arith.constant 0 : index
    %c0_0 = arith.constant 0 : index
    %0 = vector.load %arg1[%c0, %c0_0] : memref<256x128xbf16, #tpu.memory_space<vmem>>, vector<256x128xbf16>
    %c0_1 = arith.constant 0 : index
    %c0_2 = arith.constant 0 : index
    %1 = vector.load %arg2[%c0_1, %c0_2] : memref<128x128xbf16, #tpu.memory_space<vmem>>, vector<128x128xbf16>
    %cst = arith.constant dense<0.000000e+00> : vector<256x128xf32>
    %2 = tpu.matmul %0, %1, %cst {dimension_numbers = #tpu.dot_dimension_numbers<[1], [0], [0], [1], [0, 0, 1, 1], [], []>} : vector<256x128xbf16>, vector<128x128xbf16>, vector<256x128xf32> -> vector<256x128xf32>
    %c0_3 = arith.constant 0 : index
    %c0_4 = arith.constant 0 : index
    %3 = vector.load %arg3[%c0_3, %c0_4] : memref<1x128xbf16, #tpu.memory_space<vmem>>, vector<1x128xbf16>
    %4 = arith.extf %3 : vector<1x128xbf16> to vector<1x128xf32>
    %5 = vector.broadcast %4 : vector<1x128xf32> to vector<256x128xf32>
    %6 = arith.addf %2, %5 : vector<256x128xf32>
    %cst_5 = arith.constant 0.000000e+00 : f32
    %7 = vector.broadcast %cst_5 : f32 to vector<256x128xf32>
    %8 = arith.maximumf %6, %7 : vector<256x128xf32>
    %c0_6 = arith.constant 0 : index
    %c0_7 = arith.constant 0 : index
    %9 = vector.load %arg4[%c0_6, %c0_7] : memref<256x128xbf16, #tpu.memory_space<vmem>>, vector<256x128xbf16>
    %c0_8 = arith.constant 0 : index
    %c0_9 = arith.constant 0 : index
    %10 = vector.load %arg5[%c0_8, %c0_9] : memref<128x128xbf16, #tpu.memory_space<vmem>>, vector<128x128xbf16>
    %cst_10 = arith.constant dense<0.000000e+00> : vector<256x128xf32>
    %11 = tpu.matmul %9, %10, %cst_10 {dimension_numbers = #tpu.dot_dimension_numbers<[1], [0], [0], [1], [0, 0, 1, 1], [], []>} : vector<256x128xbf16>, vector<128x128xbf16>, vector<256x128xf32> -> vector<256x128xf32>
    %c0_11 = arith.constant 0 : index
    %c0_12 = arith.constant 0 : index
    %12 = vector.load %arg6[%c0_11, %c0_12] : memref<1x128xbf16, #tpu.memory_space<vmem>>, vector<1x128xbf16>
    %13 = arith.extf %12 : vector<1x128xbf16> to vector<1x128xf32>
    %14 = vector.broadcast %13 : vector<1x128xf32> to vector<256x128xf32>
    %15 = arith.addf %11, %14 : vector<256x128xf32>
    %16 = arith.addf %8, %15 : vector<256x128xf32>
    %17 = arith.truncf %16 : vector<256x128xf32> to vector<256x128xbf16>
    %c0_13 = arith.constant 0 : index
    %c0_14 = arith.constant 0 : index
    %18 = vector.load %arg7[%c0_13, %c0_14] : memref<256x128xbf16, #tpu.memory_space<vmem>>, vector<256x128xbf16>
    tpu.vector_store %arg7[%c0_13, %c0_14], %17 {strides = array<i32>} : memref<256x128xbf16, #tpu.memory_space<vmem>>, vector<256x128xbf16>,
    return
  }
  func.func @transform_0(%arg0: i32) -> (i32, i32) {
    %c0_i32 = arith.constant 0 : i32
    %c0_i32_0 = arith.constant 0 : i32
    return %arg0, %c0_i32 : i32, i32
  }
  func.func @transform_1(%arg0: i32) -> (i32, i32) {
    %c0_i32 = arith.constant 0 : i32
    %c0_i32_0 = arith.constant 0 : i32
    %c0_i32_1 = arith.constant 0 : i32
    return %c0_i32, %c0_i32_0 : i32, i32
  }
  func.func @transform_2(%arg0: i32) -> (i32, i32) {
    %c0_i32 = arith.constant 0 : i32
    %c0_i32_0 = arith.constant 0 : i32
    %c0_i32_1 = arith.constant 0 : i32
    return %c0_i32, %c0_i32_0 : i32, i32
  }
  func.func @transform_3(%arg0: i32) -> (i32, i32) {
    %c0_i32 = arith.constant 0 : i32
    %c0_i32_0 = arith.constant 0 : i32
    return %arg0, %c0_i32 : i32, i32
  }
  func.func @transform_4(%arg0: i32) -> (i32, i32) {
    %c0_i32 = arith.constant 0 : i32
    %c0_i32_0 = arith.constant 0 : i32
    %c0_i32_1 = arith.constant 0 : i32
    return %c0_i32, %c0_i32_0 : i32, i32
  }
  func.func @transform_5(%arg0: i32) -> (i32, i32) {
    %c0_i32 = arith.constant 0 : i32
    %c0_i32_0 = arith.constant 0 : i32
    %c0_i32_1 = arith.constant 0 : i32
    return %c0_i32, %c0_i32_0 : i32, i32
  }
  func.func @transform_6(%arg0: i32) -> (i32, i32) {
    %c0_i32 = arith.constant 0 : i32
    %c0_i32_0 = arith.constant 0 : i32
    return %arg0, %c0_i32 : i32, i32
  }
}

</mosaic_0001>

<bundles_post_ra>
// kernel: bottleneck_forward.3
= control target key start
LH: loop header
LB: loop body
LE: loop exit
PB: predicated region body
PF: predicated region fallthrough
CT: control target
= control target key end

     0   :  { %s1124_s12 = smov 0   ;;  %s1245_s0 = inlined_call_operand.vmem [shape: bf16[512,128], index: 0, kind: input, shape index: {}]   ;;  %s1246_s1 = inlined_call_operand.vmem [shape: bf16[128,128], index: 1, kind: input, shape index: {}]   ;;  %s1247_s2 = inlined_call_operand.vmem [shape: bf16[1,128], index: 2, kind: input, shape index: {}]   ;;  %s1248_s3 = inlined_call_operand.vmem [shape: bf16[512,128], index: 3, kind: output, shape index: {}]  }
   0x1 LB: > { %s782_s13 = sadd.s32 4294967295, %s1102_s12   ;;  %p786_p0 = scmp.ge.s32.totalorder %s1102_s12, 1  ;;  %s1102_s12 = sphi %s1124_s12, %s13_s12  }
   0x2   : > { %p138_p1 = scmp.lt.s32.totalorder %s1102_s12, 3 }
   0x4   : > { %p139_p2 = pnand %p786_p0, %p138_p1 }
   0x5   : > { %v1072_v0 = vld [vmem:[%s1246_s1] sm:$0xff] (!%p139_p2)   ;;  %s787_s16 = sshll.u32 (!%p139_p2), %s782_s13, 5  ;;  %v1073_v1 = vld [vmem:[%s1246_s1 + $0x8] sm:$0xff] (!%p139_p2)   ;;  %v1074_v2 = vld [vmem:[%s1246_s1 + $0x10] sm:$0xff] (!%p139_p2)   ;;  %v225_v24 = vlaneseq (!%p139_p2) }
   0x6   : > { %142 = sbr.rel (%p139_p2) target bundleno = 284 (0x11c), region = 32  ;;  %p163_p3 = scmp.lt.s32.totalorder (!%p139_p2), %s787_s16, 63  ;;  %1000 = vmatprep.subr.bf16.mxu0 (!%p139_p2), %v1072_v0  ;;  %1048 = vmatprep.subr.bf16.mxu1 (!%p139_p2), %v1072_v0  ;;  %v1075_v3 = vld [vmem:[%s1246_s1 + $0x18] sm:$0xff] (!%p139_p2)   ;;  %v1076_v6 = vld [vmem:[%s1246_s1 + $0x20] sm:$0xff] (!%p139_p2)   ;;  %v1077_v7 = vld [vmem:[%s1246_s1 + $0x28] sm:$0xff] (!%p139_p2)  }
   0x7   : > { %1001 = vmatpush3.bf16.msra.mxu0 (!%p139_p2), %v1072_v0  ;;  %1056 = vmatpush3.bf16.msra.mxu1 (!%p139_p2), %v1072_v0  ;;  %v1078_v8 = vld [vmem:[%s1246_s1 + $0x30] sm:$0xff] (!%p139_p2)   ;;  %v1079_v9 = vld [vmem:[%s1246_s1 + $0x38] sm:$0xff] (!%p139_p2)   ;;  %v226_v25 = vshrl.u32 (!%p139_p2), %v225_v24, 7  ;;  %v223_v26 = vld [vmem:[%s1247_s2] sm:$0x1] (!%p139_p2) }
   0x8   : > { %1002 = vmatprep.subr.bf16.mxu0 (!%p139_p2), %v1073_v1  ;;  %1049 = vmatprep.subr.bf16.mxu1 (!%p139_p2), %v1073_v1  ;;  %v224_v27 = vunpack.c.l.bf16 (!%p139_p2), %v223_v26 }
   0x9   : > { %v227_v28 = vsub.s32 (!%p139_p2), 0, %v226_v25 }
   0xb   : > { %1003 = vmatpush3.bf16.msra.mxu0 (!%p139_p2), %v1073_v1  ;;  %1057 = vmatpush3.bf16.msra.mxu1 (!%p139_p2), %v1073_v1  ;;  %v1185_v29 = vrot.slane (!%p139_p2), %v224_v27, %v227_v28 }
   0xc   : > { %1004 = vmatprep.subr.bf16.mxu0 (!%p139_p2), %v1074_v2  ;;  %1050 = vmatprep.subr.bf16.mxu1 (!%p139_p2), %v1074_v2 }
   0xd   : > { %s1250_s16 = smov (!%p163_p3, %s787_s16), 63 }
   0xe   : > { %s788_s21 = sshll.u32 %s1250_s16, 2 }
   0xf   : > { %s1149_s24 = scalar_lea.vmem %s1245_s0, %s788_s21  ;;  %1005 = vmatpush3.bf16.msra.mxu0 %v1074_v2  ;;  %1058 = vmatpush3.bf16.msra.mxu1 %v1074_v2  ;;  %s1200_s13 = scalar_lea.vmem %s1248_s3, %s788_s21 }
  0x10   : > { %v1080_v4 = vld [vmem:[%s1149_s24] sm:$0xff]   ;;  %1006 = vmatprep.subr.bf16.mxu0 %v1075_v3  ;;  %1051 = vmatprep.subr.bf16.mxu1 %v1075_v3  ;;  %v1082_v10 = vld [vmem:[%s1149_s24 + $0x8] sm:$0xff]   ;;  %v1084_v12 = vld [vmem:[%s1149_s24 + $0x10] sm:$0xff]  }
  0x11   : > { %v1081_v5 = vld [vmem:[%s1149_s24 + $0x40] sm:$0xff]   ;;  %1016 = vmatprep.mubr.bf16.mxu0 %v1080_v4  ;;  %v1083_v11 = vld [vmem:[%s1149_s24 + $0x48] sm:$0xff]   ;;  %v1085_v13 = vld [vmem:[%s1149_s24 + $0x50] sm:$0xff]  }
  0x12   : > { %1032 = vmatprep.mubr.bf16.mxu1 %v1081_v5  ;;  %v1086_v14 = vld [vmem:[%s1149_s24 + $0x18] sm:$0xff]   ;;  %v1088_v16 = vld [vmem:[%s1149_s24 + $0x20] sm:$0xff]   ;;  %v1090_v18 = vld [vmem:[%s1149_s24 + $0x28] sm:$0xff]  }
  0x13   : > { %1007 = vmatpush3.bf16.msra.mxu0 %v1075_v3  ;;  %1059 = vmatpush3.bf16.msra.mxu1 %v1075_v3  ;;  %v1087_v15 = vld [vmem:[%s1149_s24 + $0x58] sm:$0xff]   ;;  %v1089_v17 = vld [vmem:[%s1149_s24 + $0x60] sm:$0xff]   ;;  %v1091_v19 = vld [vmem:[%s1149_s24 + $0x68] sm:$0xff]  }
  0x14   : > { %1008 = vmatprep.subr.bf16.mxu0 %v1076_v6  ;;  %1052 = vmatprep.subr.bf16.mxu1 %v1076_v6  ;;  %v1092_v20 = vld [vmem:[%s1149_s24 + $0x30] sm:$0xff]   ;;  %v1094_v22 = vld [vmem:[%s1149_s24 + $0x38] sm:$0xff]  }
  0x15   : > { %v1093_v21 = vld [vmem:[%s1149_s24 + $0x70] sm:$0xff]   ;;  %v1095_v23 = vld [vmem:[%s1149_s24 + $0x78] sm:$0xff]  }
  0x17   : > { %1009 = vmatpush3.bf16.msra.mxu0 %v1076_v6  ;;  %1060 = vmatpush3.bf16.msra.mxu1 %v1076_v6 }
  0x18   : > { %1010 = vmatprep.subr.bf16.mxu0 %v1077_v7  ;;  %1053 = vmatprep.subr.bf16.mxu1 %v1077_v7 }
  0x1b   : > { %1011 = vmatpush3.bf16.msra.mxu0 %v1077_v7  ;;  %1061 = vmatpush3.bf16.msra.mxu1 %v1077_v7 }
  0x1c   : > { %1012 = vmatprep.subr.bf16.mxu0 %v1078_v8  ;;  %1054 = vmatprep.subr.bf16.mxu1 %v1078_v8 }
  0x1f   : > { %1013 = vmatpush3.bf16.msra.mxu0 %v1078_v8  ;;  %1062 = vmatpush3.bf16.msra.mxu1 %v1078_v8 }
  0x20   : > { %1014 = vmatprep.subr.bf16.mxu0 %v1079_v9  ;;  %1055 = vmatprep.subr.bf16.mxu1 %v1079_v9 }
  0x23   : > { %1015 = vmatpush3.bf16.msra.mxu0 %v1079_v9  ;;  %1063 = vmatpush3.bf16.msra.mxu1 %v1079_v9 }
  0x26   : > { %1017 = vmatmul.mubr.bf16.vlgmr.msra.gmra.mrb[0].mxu0 %v1082_v10  ;;  %1033 = vmatmul.mubr.bf16.vlgmr.msra.gmra.mrb[0].mxu1 %v1083_v11 }
  0x27   : > { %1020 = vmatprep.mubr.bf16.mxu0 %v1084_v12  ;;  %1036 = vmatprep.mubr.bf16.mxu1 %v1085_v13 }
  0x2e   : > { %1021 = vmatmul.mubr.bf16.gmra.mrb[4].mxu0 %v1086_v14  ;;  %1037 = vmatmul.mubr.bf16.gmra.mrb[4].mxu1 %v1087_v15 }
  0x2f   : > { %1024 = vmatprep.mubr.bf16.mxu0 %v1088_v16  ;;  %1040 = vmatprep.mubr.bf16.mxu1 %v1089_v17 }
  0x36   : > { %1025 = vmatmul.mubr.bf16.gmra.mrb[8].mxu0 %v1090_v18  ;;  %1041 = vmatmul.mubr.bf16.gmra.mrb[8].mxu1 %v1091_v19 }
  0x37   : > { %1028 = vmatprep.mubr.bf16.mxu0 %v1092_v20  ;;  %1044 = vmatprep.mubr.bf16.mxu1 %v1093_v21 }
  0x3e   : > { %1029 = vmatmul.mubr.bf16.gmra.mrb[12].mxu0 %v1094_v22  ;;  %1045 = vmatmul.mubr.bf16.gmra.mrb[12].mxu1 %v1095_v23 }
  0xf9   : > { %v1018_v30 = vpop.f32.mrb[0].mxu0  ;;  %v1034_v31 = vpop.f32.mrb[0].mxu1 }
  0xfa   : > { %v416_v32 = vadd.f32 %v1018_v30, %v1185_v29  ;;  %v480_v33 = vadd.f32 %v1034_v31, %v1185_v29  ;;  %v407_v34 = vpop.f32.mrb[1].mxu0  ;;  %v471_v35 = vpop.f32.mrb[1].mxu1 }
  0xfb   : > { %v408_v36 = vadd.f32 %v407_v34, %v1185_v29  ;;  %v472_v37 = vadd.f32 %v471_v35, %v1185_v29  ;;  %v1019_v38 = vpop.f32.mrb[2].mxu0  ;;  %v1035_v39 = vpop.f32.mrb[2].mxu1 }
  0xfc   : > { %v419_v40 = vadd.f32 %v1019_v38, %v1185_v29  ;;  %v483_v41 = vadd.f32 %v1035_v39, %v1185_v29  ;;  %v410_v42 = vpop.f32.mrb[3].mxu0  ;;  %v474_v43 = vpop.f32.mrb[3].mxu1  ;;  %v536_v46 = vmax.f32 %v416_v32, 0.0  ;;  %v552_v47 = vmax.f32 %v480_v33, 0.0 }
  0xfd   : > { %v411_v44 = vadd.f32 %v410_v42, %v1185_v29  ;;  %v475_v45 = vadd.f32 %v474_v43, %v1185_v29  ;;  %v534_v50 = vmax.f32 %v408_v36, 0.0  ;;  %v550_v51 = vmax.f32 %v472_v37, 0.0 }
  0xfe   : > { %v537_v48 = vmax.f32 %v419_v40, 0.0  ;;  %v553_v49 = vmax.f32 %v483_v41, 0.0 }
  0xff   : > { %v535_v52 = vmax.f32 %v411_v44, 0.0  ;;  %v551_v53 = vmax.f32 %v475_v45, 0.0 }
 0x100   : > { %v889_v54 = vpack.c.bf16 %v537_v48, %v536_v46  ;;  %v929_v55 = vpack.c.bf16 %v553_v49, %v552_v47 }
 0x101   : > { %v884_v56 = vpack.c.bf16 %v535_v52, %v534_v50  ;;  %v924_v57 = vpack.c.bf16 %v551_v53, %v550_v51  ;;  %v1022_v58 = vpop.f32.mrb[4].mxu0  ;;  %v1038_v59 = vpop.f32.mrb[4].mxu1 }
 0x102   : > { %961 = vst [vmem:[%s1200_s13 + $0x8] sm:$0xff] %v889_v54   ;;  %969 = vst [vmem:[%s1200_s13 + $0x48] sm:$0xff] %v929_v55   ;;  %v432_v60 = vadd.f32 %v1022_v58, %v1185_v29  ;;  %v496_v61 = vadd.f32 %v1038_v59, %v1185_v29  ;;  %v423_v62 = vpop.f32.mrb[5].mxu0  ;;  %v487_v63 = vpop.f32.mrb[5].mxu1 }
 0x103   : > { %885 = vst [vmem:[%s1200_s13] sm:$0xff] %v884_v56   ;;  %968 = vst [vmem:[%s1200_s13 + $0x40] sm:$0xff] %v924_v57   ;;  %v424_v0 = vadd.f32 %v423_v62, %v1185_v29  ;;  %v488_v1 = vadd.f32 %v487_v63, %v1185_v29  ;;  %v1023_v2 = vpop.f32.mrb[6].mxu0  ;;  %v1039_v3 = vpop.f32.mrb[6].mxu1 }
 0x104   : > { %v435_v4 = vadd.f32 %v1023_v2, %v1185_v29  ;;  %v499_v5 = vadd.f32 %v1039_v3, %v1185_v29  ;;  %v426_v6 = vpop.f32.mrb[7].mxu0  ;;  %v490_v7 = vpop.f32.mrb[7].mxu1  ;;  %v540_v10 = vmax.f32 %v432_v60, 0.0  ;;  %v556_v11 = vmax.f32 %v496_v61, 0.0 }
 0x105   : > { %v427_v8 = vadd.f32 %v426_v6, %v1185_v29  ;;  %v491_v9 = vadd.f32 %v490_v7, %v1185_v29  ;;  %v538_v14 = vmax.f32 %v424_v0, 0.0  ;;  %v554_v15 = vmax.f32 %v488_v1, 0.0 }
 0x106   : > { %v541_v12 = vmax.f32 %v435_v4, 0.0  ;;  %v557_v13 = vmax.f32 %v499_v5, 0.0 }
 0x107   : > { %v539_v16 = vmax.f32 %v427_v8, 0.0  ;;  %v555_v17 = vmax.f32 %v491_v9, 0.0 }
 0x108   : > { %v899_v18 = vpack.c.bf16 %v541_v12, %v540_v10  ;;  %v939_v19 = vpack.c.bf16 %v557_v13, %v556_v11 }
 0x109   : > { %v894_v20 = vpack.c.bf16 %v539_v16, %v538_v14  ;;  %v934_v21 = vpack.c.bf16 %v555_v17, %v554_v15  ;;  %v1026_v22 = vpop.f32.mrb[8].mxu0  ;;  %v1042_v23 = vpop.f32.mrb[8].mxu1 }
 0x10a   : > { %963 = vst [vmem:[%s1200_s13 + $0x18] sm:$0xff] %v899_v18   ;;  %971 = vst [vmem:[%s1200_s13 + $0x58] sm:$0xff] %v939_v19   ;;  %v448_v24 = vadd.f32 %v1026_v22, %v1185_v29  ;;  %v512_v25 = vadd.f32 %v1042_v23, %v1185_v29  ;;  %v439_v26 = vpop.f32.mrb[9].mxu0  ;;  %v503_v27 = vpop.f32.mrb[9].mxu1 }
 0x10b   : > { %962 = vst [vmem:[%s1200_s13 + $0x10] sm:$0xff] %v894_v20   ;;  %970 = vst [vmem:[%s1200_s13 + $0x50] sm:$0xff] %v934_v21   ;;  %v440_v28 = vadd.f32 %v439_v26, %v1185_v29  ;;  %v504_v30 = vadd.f32 %v503_v27, %v1185_v29  ;;  %v1027_v31 = vpop.f32.mrb[10].mxu0  ;;  %v1043_v32 = vpop.f32.mrb[10].mxu1 }
 0x10c   : > { %v451_v33 = vadd.f32 %v1027_v31, %v1185_v29  ;;  %v515_v34 = vadd.f32 %v1043_v32, %v1185_v29  ;;  %v442_v35 = vpop.f32.mrb[11].mxu0  ;;  %v506_v36 = vpop.f32.mrb[11].mxu1  ;;  %v544_v39 = vmax.f32 %v448_v24, 0.0  ;;  %v560_v40 = vmax.f32 %v512_v25, 0.0 }
 0x10d   : > { %v443_v37 = vadd.f32 %v442_v35, %v1185_v29  ;;  %v507_v38 = vadd.f32 %v506_v36, %v1185_v29  ;;  %v542_v43 = vmax.f32 %v440_v28, 0.0  ;;  %v558_v44 = vmax.f32 %v504_v30, 0.0 }
 0x10e   : > { %v545_v41 = vmax.f32 %v451_v33, 0.0  ;;  %v561_v42 = vmax.f32 %v515_v34, 0.0 }
 0x10f   : > { %v543_v45 = vmax.f32 %v443_v37, 0.0  ;;  %v559_v46 = vmax.f32 %v507_v38, 0.0 }
 0x110   : > { %v909_v47 = vpack.c.bf16 %v545_v41, %v544_v39  ;;  %v949_v48 = vpack.c.bf16 %v561_v42, %v560_v40 }
 0x111   : > { %v904_v49 = vpack.c.bf16 %v543_v45, %v542_v43  ;;  %v944_v50 = vpack.c.bf16 %v559_v46, %v558_v44  ;;  %v1030_v51 = vpop.f32.mrb[12].mxu0  ;;  %v1046_v52 = vpop.f32.mrb[12].mxu1 }
 0x112   : > { %965 = vst [vmem:[%s1200_s13 + $0x28] sm:$0xff] %v909_v47   ;;  %973 = vst [vmem:[%s1200_s13 + $0x68] sm:$0xff] %v949_v48   ;;  %v464_v53 = vadd.f32 %v1030_v51, %v1185_v29  ;;  %v528_v54 = vadd.f32 %v1046_v52, %v1185_v29  ;;  %v455_v55 = vpop.f32.mrb[13].mxu0  ;;  %v519_v56 = vpop.f32.mrb[13].mxu1 }
 0x113   : > { %964 = vst [vmem:[%s1200_s13 + $0x20] sm:$0xff] %v904_v49   ;;  %972 = vst [vmem:[%s1200_s13 + $0x60] sm:$0xff] %v944_v50   ;;  %v456_v57 = vadd.f32 %v455_v55, %v1185_v29  ;;  %v520_v58 = vadd.f32 %v519_v56, %v1185_v29  ;;  %v1031_v59 = vpop.f32.mrb[14].mxu0  ;;  %v1047_v60 = vpop.f32.mrb[14].mxu1 }
 0x114   : > { %v467_v61 = vadd.f32 %v1031_v59, %v1185_v29  ;;  %v531_v62 = vadd.f32 %v1047_v60, %v1185_v29  ;;  %v458_v63 = vpop.f32.mrb[15].mxu0  ;;  %v522_v0 = vpop.f32.mrb[15].mxu1  ;;  %v548_v3 = vmax.f32 %v464_v53, 0.0  ;;  %v564_v4 = vmax.f32 %v528_v54, 0.0 }
 0x115   : > { %v459_v1 = vadd.f32 %v458_v63, %v1185_v29  ;;  %v523_v2 = vadd.f32 %v522_v0, %v1185_v29  ;;  %v546_v7 = vmax.f32 %v456_v57, 0.0  ;;  %v562_v8 = vmax.f32 %v520_v58, 0.0 }
 0x116   : > { %v549_v5 = vmax.f32 %v467_v61, 0.0  ;;  %v565_v6 = vmax.f32 %v531_v62, 0.0 }
 0x117   : > { %v547_v9 = vmax.f32 %v459_v1, 0.0  ;;  %v563_v10 = vmax.f32 %v523_v2, 0.0 }
 0x118   : > { %v919_v11 = vpack.c.bf16 %v549_v5, %v548_v3  ;;  %v959_v12 = vpack.c.bf16 %v565_v6, %v564_v4 }
 0x119   : > { %v914_v13 = vpack.c.bf16 %v547_v9, %v546_v7  ;;  %v954_v14 = vpack.c.bf16 %v563_v10, %v562_v8 }
 0x11a   : > { %967 = vst [vmem:[%s1200_s13 + $0x38] sm:$0xff] %v919_v11   ;;  %975 = vst [vmem:[%s1200_s13 + $0x78] sm:$0xff] %v959_v12  }
 0x11b   : > { %966 = vst [vmem:[%s1200_s13 + $0x30] sm:$0xff] %v914_v13   ;;  %974 = vst [vmem:[%s1200_s13 + $0x70] sm:$0xff] %v954_v14  }
 0x11c PF: > { %s13_s12 = sadd.s32 1, %s1102_s12  }
 0x11d   : > { %p10_p4 = scmp.ge.s32.totalorder %s13_s12, 4  }
 0x11f   :  { %12 = sbr.rel (!%p10_p4) target bundleno = 1 (0x1), region = 62 }

// kernel: bottleneck_forward.5
= control target key start
LH: loop header
LB: loop body
LE: loop exit
PB: predicated region body
PF: predicated region fallthrough
CT: control target
= control target key end

     0   :  { %s1751_s21 = smov 0   ;;  %s1952_s0 = inlined_call_operand.vmem [shape: bf16[512,128], index: 0, kind: input, shape index: {}]   ;;  %s1953_s1 = inlined_call_operand.vmem [shape: bf16[128,128], index: 1, kind: input, shape index: {}]   ;;  %s1954_s2 = inlined_call_operand.vmem [shape: bf16[1,128], index: 2, kind: input, shape index: {}]   ;;  %s1955_s3 = inlined_call_operand.vmem [shape: bf16[512,128], index: 3, kind: input, shape index: {}]   ;;  %s1956_s4 = inlined_call_operand.vmem [shape: bf16[128,128], index: 4, kind: input, shape index: {}]   ;;  %s1957_s5 = inlined_call_operand.vmem [shape: bf16[1,128], index: 5, kind: input, shape index: {}]   ;;  %s1958_s6 = inlined_call_operand.vmem [shape: bf16[512,128], index: 6, kind: output, shape index: {}]  }
   0x1 LB: > { %s1288_s22 = sadd.s32 4294967295, %s1714_s21   ;;  %p1292_p0 = scmp.ge.s32.totalorder %s1714_s21, 1  ;;  %s1714_s21 = sphi %s1751_s21, %s16_s21  }
   0x2   : > { %p224_p1 = scmp.lt.s32.totalorder %s1714_s21, 3 }
   0x4   : > { %p225_p2 = pnand %p1292_p0, %p224_p1 }
   0x5   : > { %v1660_v0 = vld [vmem:[%s1953_s1] sm:$0xff] (!%p225_p2)   ;;  %s1293_s25 = sshll.u32 (!%p225_p2), %s1288_s22, 5  ;;  %v1662_v2 = vld [vmem:[%s1953_s1 + $0x8] sm:$0xff] (!%p225_p2)   ;;  %v1664_v4 = vld [vmem:[%s1953_s1 + $0x10] sm:$0xff] (!%p225_p2)   ;;  %v328_v48 = vlaneseq (!%p225_p2) }
   0x6   : > { %228 = sbr.rel (%p225_p2) target bundleno = 318 (0x13e), region = 44  ;;  %v1661_v1 = vld [vmem:[%s1956_s4] sm:$0xff] (!%p225_p2)   ;;  %1556 = vmatprep.subr.bf16.mxu0 (!%p225_p2), %v1660_v0  ;;  %p260_p3 = scmp.lt.s32.totalorder (!%p225_p2), %s1293_s25, 63  ;;  %v1663_v3 = vld [vmem:[%s1956_s4 + $0x8] sm:$0xff] (!%p225_p2)   ;;  %v1665_v5 = vld [vmem:[%s1956_s4 + $0x10] sm:$0xff] (!%p225_p2)  }
   0x7   : > { %1604 = vmatprep.subr.bf16.mxu1 (!%p225_p2), %v1661_v1  ;;  %1557 = vmatpush3.bf16.msra.mxu0 (!%p225_p2), %v1660_v0  ;;  %v1666_v6 = vld [vmem:[%s1953_s1 + $0x18] sm:$0xff] (!%p225_p2)   ;;  %v1668_v8 = vld [vmem:[%s1953_s1 + $0x20] sm:$0xff] (!%p225_p2)   ;;  %v1670_v10 = vld [vmem:[%s1953_s1 + $0x28] sm:$0xff] (!%p225_p2)   ;;  %v329_v49 = vshrl.u32 (!%p225_p2), %v328_v48, 7 }
   0x8   : > { %1605 = vmatpush3.bf16.msra.mxu1 (!%p225_p2), %v1661_v1  ;;  %1558 = vmatprep.subr.bf16.mxu0 (!%p225_p2), %v1662_v2  ;;  %v1667_v7 = vld [vmem:[%s1956_s4 + $0x18] sm:$0xff] (!%p225_p2)   ;;  %v1669_v9 = vld [vmem:[%s1956_s4 + $0x20] sm:$0xff] (!%p225_p2)   ;;  %v1671_v11 = vld [vmem:[%s1956_s4 + $0x28] sm:$0xff] (!%p225_p2)  }
   0x9   : > { %1606 = vmatprep.subr.bf16.mxu1 (!%p225_p2), %v1663_v3  ;;  %v1672_v14 = vld [vmem:[%s1953_s1 + $0x30] sm:$0xff] (!%p225_p2)   ;;  %v1674_v16 = vld [vmem:[%s1953_s1 + $0x38] sm:$0xff] (!%p225_p2)   ;;  %v326_v50 = vld [vmem:[%s1954_s2] sm:$0x1] (!%p225_p2)  ;;  %v330_v53 = vsub.s32 (!%p225_p2), 0, %v329_v49 }
   0xa   : > { %v1673_v15 = vld [vmem:[%s1956_s4 + $0x30] sm:$0xff] (!%p225_p2)   ;;  %v1675_v17 = vld [vmem:[%s1956_s4 + $0x38] sm:$0xff] (!%p225_p2)   ;;  %v717_v51 = vld [vmem:[%s1957_s5] sm:$0x1] (!%p225_p2)  ;;  %v327_v52 = vunpack.c.l.bf16 (!%p225_p2), %v326_v50 }
   0xb   : > { %1559 = vmatpush3.bf16.msra.mxu0 (!%p225_p2), %v1662_v2  ;;  %v718_v54 = vunpack.c.l.bf16 (!%p225_p2), %v717_v51 }
   0xc   : > { %1607 = vmatpush3.bf16.msra.mxu1 (!%p225_p2), %v1663_v3  ;;  %1560 = vmatprep.subr.bf16.mxu0 (!%p225_p2), %v1664_v4  ;;  %v1859_v55 = vrot.slane (!%p225_p2), %v327_v52, %v330_v53 }
   0xd   : > { %s1960_s25 = smov (!%p260_p3, %s1293_s25), 63  ;;  %1608 = vmatprep.subr.bf16.mxu1 %v1665_v5  ;;  %v1861_v56 = vrot.slane %v718_v54, %v330_v53 }
   0xe   : > { %s1783_s16 = sshll.u32 %s1960_s25, 2 }
   0xf   : > { %1561 = vmatpush3.bf16.msra.mxu0 %v1664_v4  ;;  %s1795_s24 = scalar_lea.vmem %s1952_s0, %s1783_s16  ;;  %s1804_s29 = scalar_lea.vmem %s1955_s3, %s1783_s16 }
  0x10   : > { %1609 = vmatpush3.bf16.msra.mxu1 %v1665_v5  ;;  %1562 = vmatprep.subr.bf16.mxu0 %v1666_v6  ;;  %v1676_v12 = vld [vmem:[%s1795_s24] sm:$0xff]   ;;  %v1678_v18 = vld [vmem:[%s1795_s24 + $0x8] sm:$0xff]   ;;  %v1680_v20 = vld [vmem:[%s1795_s24 + $0x10] sm:$0xff]  }
  0x11   : > { %1610 = vmatprep.subr.bf16.mxu1 %v1667_v7  ;;  %v1677_v13 = vld [vmem:[%s1804_s29] sm:$0xff]   ;;  %1572 = vmatprep.mubr.bf16.mxu0 %v1676_v12  ;;  %v1679_v19 = vld [vmem:[%s1804_s29 + $0x8] sm:$0xff]   ;;  %v1681_v21 = vld [vmem:[%s1804_s29 + $0x10] sm:$0xff]  }
  0x12   : > { %1620 = vmatprep.mubr.bf16.mxu1 %v1677_v13  ;;  %v1682_v22 = vld [vmem:[%s1795_s24 + $0x18] sm:$0xff]   ;;  %v1684_v24 = vld [vmem:[%s1795_s24 + $0x20] sm:$0xff]   ;;  %v1686_v26 = vld [vmem:[%s1795_s24 + $0x28] sm:$0xff]  }
  0x13   : > { %1563 = vmatpush3.bf16.msra.mxu0 %v1666_v6  ;;  %v1683_v23 = vld [vmem:[%s1804_s29 + $0x18] sm:$0xff]   ;;  %v1685_v25 = vld [vmem:[%s1804_s29 + $0x20] sm:$0xff]   ;;  %v1687_v27 = vld [vmem:[%s1804_s29 + $0x28] sm:$0xff]  }
  0x14   : > { %1611 = vmatpush3.bf16.msra.mxu1 %v1667_v7  ;;  %1564 = vmatprep.subr.bf16.mxu0 %v1668_v8  ;;  %v1688_v28 = vld [vmem:[%s1795_s24 + $0x30] sm:$0xff]   ;;  %v1690_v30 = vld [vmem:[%s1795_s24 + $0x38] sm:$0xff]   ;;  %v1692_v32 = vld [vmem:[%s1795_s24 + $0x40] sm:$0xff]  }
  0x15   : > { %1612 = vmatprep.subr.bf16.mxu1 %v1669_v9  ;;  %v1689_v29 = vld [vmem:[%s1804_s29 + $0x30] sm:$0xff]   ;;  %v1691_v31 = vld [vmem:[%s1804_s29 + $0x38] sm:$0xff]   ;;  %v1693_v33 = vld [vmem:[%s1804_s29 + $0x40] sm:$0xff]  }
  0x16   : > { %v1694_v34 = vld [vmem:[%s1795_s24 + $0x48] sm:$0xff]   ;;  %v1696_v36 = vld [vmem:[%s1795_s24 + $0x50] sm:$0xff]   ;;  %v1698_v38 = vld [vmem:[%s1795_s24 + $0x58] sm:$0xff]  }
  0x17   : > { %1565 = vmatpush3.bf16.msra.mxu0 %v1668_v8  ;;  %v1695_v35 = vld [vmem:[%s1804_s29 + $0x48] sm:$0xff]   ;;  %v1697_v37 = vld [vmem:[%s1804_s29 + $0x50] sm:$0xff]   ;;  %v1699_v39 = vld [vmem:[%s1804_s29 + $0x58] sm:$0xff]  }
  0x18   : > { %1613 = vmatpush3.bf16.msra.mxu1 %v1669_v9  ;;  %1566 = vmatprep.subr.bf16.mxu0 %v1670_v10  ;;  %v1700_v40 = vld [vmem:[%s1795_s24 + $0x60] sm:$0xff]   ;;  %v1702_v42 = vld [vmem:[%s1795_s24 + $0x68] sm:$0xff]   ;;  %v1704_v44 = vld [vmem:[%s1795_s24 + $0x70] sm:$0xff]  }
  0x19   : > { %1614 = vmatprep.subr.bf16.mxu1 %v1671_v11  ;;  %v1701_v41 = vld [vmem:[%s1804_s29 + $0x60] sm:$0xff]   ;;  %v1703_v43 = vld [vmem:[%s1804_s29 + $0x68] sm:$0xff]   ;;  %v1705_v45 = vld [vmem:[%s1804_s29 + $0x70] sm:$0xff]  }
  0x1a   : > { %v1706_v46 = vld [vmem:[%s1795_s24 + $0x78] sm:$0xff]   ;;  %s1875_s24 = scalar_lea.vmem %s1958_s6, %s1783_s16 }
  0x1b   : > { %1567 = vmatpush3.bf16.msra.mxu0 %v1670_v10  ;;  %v1707_v47 = vld [vmem:[%s1804_s29 + $0x78] sm:$0xff]  }
  0x1c   : > { %1615 = vmatpush3.bf16.msra.mxu1 %v1671_v11  ;;  %1568 = vmatprep.subr.bf16.mxu0 %v1672_v14 }
  0x1d   : > { %1616 = vmatprep.subr.bf16.mxu1 %v1673_v15 }
  0x1f   : > { %1569 = vmatpush3.bf16.msra.mxu0 %v1672_v14 }
  0x20   : > { %1617 = vmatpush3.bf16.msra.mxu1 %v1673_v15  ;;  %1570 = vmatprep.subr.bf16.mxu0 %v1674_v16 }
  0x21   : > { %1618 = vmatprep.subr.bf16.mxu1 %v1675_v17 }
  0x23   : > { %1571 = vmatpush3.bf16.msra.mxu0 %v1674_v16 }
  0x24   : > { %1619 = vmatpush3.bf16.msra.mxu1 %v1675_v17 }
  0x26   : > { %1573 = vmatmul.mubr.bf16.vlgmr.msra.gmra.mrb[0].mxu0 %v1678_v18 }
  0x27   : > { %1621 = vmatmul.mubr.bf16.vlgmr.msra.gmra.mrb[0].mxu1 %v1679_v19  ;;  %1576 = vmatprep.mubr.bf16.mxu0 %v1680_v20 }
  0x28   : > { %1624 = vmatprep.mubr.bf16.mxu1 %v1681_v21 }
  0x2e   : > { %1577 = vmatmul.mubr.bf16.gmra.mrb[4].mxu0 %v1682_v22 }
  0x2f   : > { %1625 = vmatmul.mubr.bf16.gmra.mrb[4].mxu1 %v1683_v23  ;;  %1580 = vmatprep.mubr.bf16.mxu0 %v1684_v24 }
  0x30   : > { %1628 = vmatprep.mubr.bf16.mxu1 %v1685_v25 }
  0x36   : > { %1581 = vmatmul.mubr.bf16.gmra.mrb[8].mxu0 %v1686_v26 }
  0x37   : > { %1629 = vmatmul.mubr.bf16.gmra.mrb[8].mxu1 %v1687_v27  ;;  %1584 = vmatprep.mubr.bf16.mxu0 %v1688_v28 }
  0x38   : > { %1632 = vmatprep.mubr.bf16.mxu1 %v1689_v29 }
  0x3e   : > { %1585 = vmatmul.mubr.bf16.gmra.mrb[12].mxu0 %v1690_v30 }
  0x3f   : > { %1633 = vmatmul.mubr.bf16.gmra.mrb[12].mxu1 %v1691_v31  ;;  %1588 = vmatprep.mubr.bf16.mxu0 %v1692_v32 }
  0x40   : > { %1636 = vmatprep.mubr.bf16.mxu1 %v1693_v33 }
  0x46   : > { %1589 = vmatmul.mubr.bf16.gmra.mrb[16].mxu0 %v1694_v34 }
  0x47   : > { %1637 = vmatmul.mubr.bf16.gmra.mrb[16].mxu1 %v1695_v35  ;;  %1592 = vmatprep.mubr.bf16.mxu0 %v1696_v36 }
  0x48   : > { %1640 = vmatprep.mubr.bf16.mxu1 %v1697_v37 }
  0x4e   : > { %1593 = vmatmul.mubr.bf16.gmra.mrb[20].mxu0 %v1698_v38 }
  0x4f   : > { %1641 = vmatmul.mubr.bf16.gmra.mrb[20].mxu1 %v1699_v39  ;;  %1596 = vmatprep.mubr.bf16.mxu0 %v1700_v40 }
  0x50   : > { %1644 = vmatprep.mubr.bf16.mxu1 %v1701_v41 }
  0x56   : > { %1597 = vmatmul.mubr.bf16.gmra.mrb[24].mxu0 %v1702_v42 }
  0x57   : > { %1645 = vmatmul.mubr.bf16.gmra.mrb[24].mxu1 %v1703_v43  ;;  %1600 = vmatprep.mubr.bf16.mxu0 %v1704_v44 }
  0x58   : > { %1648 = vmatprep.mubr.bf16.mxu1 %v1705_v45 }
  0x5e   : > { %1601 = vmatmul.mubr.bf16.gmra.mrb[28].mxu0 %v1706_v46 }
  0x5f   : > { %1649 = vmatmul.mubr.bf16.gmra.mrb[28].mxu1 %v1707_v47 }
  0xf9   : > { %v1574_v57 = vpop.f32.mrb[0].mxu0 }
  0xfa   : > { %v519_v58 = vadd.f32 %v1574_v57, %v1859_v55  ;;  %v1622_v59 = vpop.f32.mrb[0].mxu1  ;;  %v510_v60 = vpop.f32.mrb[1].mxu0 }
  0xfb   : > { %v910_v61 = vadd.f32 %v1622_v59, %v1861_v56  ;;  %v511_v62 = vadd.f32 %v510_v60, %v1859_v55  ;;  %v901_v63 = vpop.f32.mrb[1].mxu1  ;;  %v1575_v0 = vpop.f32.mrb[2].mxu0 }
  0xfc   : > { %v639_v1 = vmax.f32 %v519_v58, 0.0  ;;  %v902_v2 = vadd.f32 %v901_v63, %v1861_v56  ;;  %v522_v3 = vadd.f32 %v1575_v0, %v1859_v55  ;;  %v1623_v4 = vpop.f32.mrb[2].mxu1  ;;  %v513_v5 = vpop.f32.mrb[3].mxu0 }
  0xfd   : > { %v637_v6 = vmax.f32 %v511_v62, 0.0  ;;  %v514_v7 = vadd.f32 %v513_v5, %v1859_v55  ;;  %v904_v8 = vpop.f32.mrb[3].mxu1  ;;  %v913_v11 = vadd.f32 %v1623_v4, %v1861_v56 }
  0xfe   : > { %v1030_v9 = vadd.f32 %v910_v61, %v639_v1  ;;  %v640_v10 = vmax.f32 %v522_v3, 0.0  ;;  %v905_v14 = vadd.f32 %v904_v8, %v1861_v56 }
  0xff   : > { %v1028_v12 = vadd.f32 %v902_v2, %v637_v6  ;;  %v638_v13 = vmax.f32 %v514_v7, 0.0 }
 0x100   : > { %v1031_v15 = vadd.f32 %v913_v11, %v640_v10 }
 0x101   : > { %v1029_v16 = vadd.f32 %v905_v14, %v638_v13  ;;  %v1578_v17 = vpop.f32.mrb[4].mxu0 }
 0x102   : > { %v1421_v18 = vpack.c.bf16 %v1031_v15, %v1030_v9  ;;  %v535_v19 = vadd.f32 %v1578_v17, %v1859_v55  ;;  %v1626_v20 = vpop.f32.mrb[4].mxu1  ;;  %v526_v21 = vpop.f32.mrb[5].mxu0 }
 0x103   : > { %v1416_v22 = vpack.c.bf16 %v1029_v16, %v1028_v12  ;;  %v926_v23 = vadd.f32 %v1626_v20, %v1861_v56  ;;  %v527_v24 = vadd.f32 %v526_v21, %v1859_v55  ;;  %v917_v25 = vpop.f32.mrb[5].mxu1  ;;  %v1579_v26 = vpop.f32.mrb[6].mxu0 }
 0x104   : > { %1493 = vst [vmem:[%s1875_s24 + $0x8] sm:$0xff] %v1421_v18   ;;  %v643_v27 = vmax.f32 %v535_v19, 0.0  ;;  %v918_v28 = vadd.f32 %v917_v25, %v1861_v56  ;;  %v538_v29 = vadd.f32 %v1579_v26, %v1859_v55  ;;  %v1627_v30 = vpop.f32.mrb[6].mxu1  ;;  %v529_v31 = vpop.f32.mrb[7].mxu0 }
 0x105   : > { %1417 = vst [vmem:[%s1875_s24] sm:$0xff] %v1416_v22   ;;  %v641_v32 = vmax.f32 %v527_v24, 0.0  ;;  %v530_v33 = vadd.f32 %v529_v31, %v1859_v55  ;;  %v920_v34 = vpop.f32.mrb[7].mxu1  ;;  %v929_v37 = vadd.f32 %v1627_v30, %v1861_v56 }
 0x106   : > { %v1034_v35 = vadd.f32 %v926_v23, %v643_v27  ;;  %v644_v36 = vmax.f32 %v538_v29, 0.0  ;;  %v921_v40 = vadd.f32 %v920_v34, %v1861_v56 }
 0x107   : > { %v1032_v38 = vadd.f32 %v918_v28, %v641_v32  ;;  %v642_v39 = vmax.f32 %v530_v33, 0.0 }
 0x108   : > { %v1035_v41 = vadd.f32 %v929_v37, %v644_v36 }
 0x109   : > { %v1033_v42 = vadd.f32 %v921_v40, %v642_v39  ;;  %v1582_v43 = vpop.f32.mrb[8].mxu0 }
 0x10a   : > { %v1431_v44 = vpack.c.bf16 %v1035_v41, %v1034_v35  ;;  %v551_v45 = vadd.f32 %v1582_v43, %v1859_v55  ;;  %v1630_v46 = vpop.f32.mrb[8].mxu1  ;;  %v542_v47 = vpop.f32.mrb[9].mxu0 }
 0x10b   : > { %v1426_v48 = vpack.c.bf16 %v1033_v42, %v1032_v38  ;;  %v942_v49 = vadd.f32 %v1630_v46, %v1861_v56  ;;  %v543_v50 = vadd.f32 %v542_v47, %v1859_v55  ;;  %v933_v51 = vpop.f32.mrb[9].mxu1  ;;  %v1583_v52 = vpop.f32.mrb[10].mxu0 }
 0x10c   : > { %1495 = vst [vmem:[%s1875_s24 + $0x18] sm:$0xff] %v1431_v44   ;;  %v647_v53 = vmax.f32 %v551_v45, 0.0  ;;  %v934_v54 = vadd.f32 %v933_v51, %v1861_v56  ;;  %v554_v57 = vadd.f32 %v1583_v52, %v1859_v55  ;;  %v1631_v58 = vpop.f32.mrb[10].mxu1  ;;  %v545_v59 = vpop.f32.mrb[11].mxu0 }
 0x10d   : > { %1494 = vst [vmem:[%s1875_s24 + $0x10] sm:$0xff] %v1426_v48   ;;  %v645_v60 = vmax.f32 %v543_v50, 0.0  ;;  %v546_v61 = vadd.f32 %v545_v59, %v1859_v55  ;;  %v936_v62 = vpop.f32.mrb[11].mxu1  ;;  %v945_v1 = vadd.f32 %v1631_v58, %v1861_v56 }
 0x10e   : > { %v1038_v63 = vadd.f32 %v942_v49, %v647_v53  ;;  %v648_v0 = vmax.f32 %v554_v57, 0.0  ;;  %v937_v4 = vadd.f32 %v936_v62, %v1861_v56 }
 0x10f   : > { %v1036_v2 = vadd.f32 %v934_v54, %v645_v60  ;;  %v646_v3 = vmax.f32 %v546_v61, 0.0 }
 0x110   : > { %v1039_v5 = vadd.f32 %v945_v1, %v648_v0 }
 0x111   : > { %v1037_v6 = vadd.f32 %v937_v4, %v646_v3  ;;  %v1586_v7 = vpop.f32.mrb[12].mxu0 }
 0x112   : > { %v1441_v8 = vpack.c.bf16 %v1039_v5, %v1038_v63  ;;  %v567_v9 = vadd.f32 %v1586_v7, %v1859_v55  ;;  %v1634_v10 = vpop.f32.mrb[12].mxu1  ;;  %v558_v11 = vpop.f32.mrb[13].mxu0 }
 0x113   : > { %v1436_v12 = vpack.c.bf16 %v1037_v6, %v1036_v2  ;;  %v958_v13 = vadd.f32 %v1634_v10, %v1861_v56  ;;  %v559_v14 = vadd.f32 %v558_v11, %v1859_v55  ;;  %v949_v15 = vpop.f32.mrb[13].mxu1  ;;  %v1587_v16 = vpop.f32.mrb[14].mxu0 }
 0x114   : > { %1497 = vst [vmem:[%s1875_s24 + $0x28] sm:$0xff] %v1441_v8   ;;  %v651_v17 = vmax.f32 %v567_v9, 0.0  ;;  %v950_v18 = vadd.f32 %v949_v15, %v1861_v56  ;;  %v570_v19 = vadd.f32 %v1587_v16, %v1859_v55  ;;  %v1635_v20 = vpop.f32.mrb[14].mxu1  ;;  %v561_v21 = vpop.f32.mrb[15].mxu0 }
 0x115   : > { %1496 = vst [vmem:[%s1875_s24 + $0x20] sm:$0xff] %v1436_v12   ;;  %v649_v22 = vmax.f32 %v559_v14, 0.0  ;;  %v562_v23 = vadd.f32 %v561_v21, %v1859_v55  ;;  %v952_v24 = vpop.f32.mrb[15].mxu1  ;;  %v961_v27 = vadd.f32 %v1635_v20, %v1861_v56 }
 0x116   : > { %v1042_v25 = vadd.f32 %v958_v13, %v651_v17  ;;  %v652_v26 = vmax.f32 %v570_v19, 0.0  ;;  %v953_v30 = vadd.f32 %v952_v24, %v1861_v56 }
 0x117   : > { %v1040_v28 = vadd.f32 %v950_v18, %v649_v22  ;;  %v650_v29 = vmax.f32 %v562_v23, 0.0 }
 0x118   : > { %v1043_v31 = vadd.f32 %v961_v27, %v652_v26 }
 0x119   : > { %v1041_v32 = vadd.f32 %v953_v30, %v650_v29  ;;  %v1590_v33 = vpop.f32.mrb[16].mxu0 }
 0x11a   : > { %v1451_v34 = vpack.c.bf16 %v1043_v31, %v1042_v25  ;;  %v583_v35 = vadd.f32 %v1590_v33, %v1859_v55  ;;  %v1638_v36 = vpop.f32.mrb[16].mxu1  ;;  %v574_v37 = vpop.f32.mrb[17].mxu0 }
 0x11b   : > { %v1446_v38 = vpack.c.bf16 %v1041_v32, %v1040_v28  ;;  %v974_v39 = vadd.f32 %v1638_v36, %v1861_v56  ;;  %v575_v40 = vadd.f32 %v574_v37, %v1859_v55  ;;  %v965_v41 = vpop.f32.mrb[17].mxu1  ;;  %v1591_v42 = vpop.f32.mrb[18].mxu0 }
 0x11c   : > { %1499 = vst [vmem:[%s1875_s24 + $0x38] sm:$0xff] %v1451_v34   ;;  %v655_v43 = vmax.f32 %v583_v35, 0.0  ;;  %v966_v44 = vadd.f32 %v965_v41, %v1861_v56  ;;  %v586_v45 = vadd.f32 %v1591_v42, %v1859_v55  ;;  %v1639_v46 = vpop.f32.mrb[18].mxu1  ;;  %v577_v47 = vpop.f32.mrb[19].mxu0 }
 0x11d   : > { %1498 = vst [vmem:[%s1875_s24 + $0x30] sm:$0xff] %v1446_v38   ;;  %v653_v48 = vmax.f32 %v575_v40, 0.0  ;;  %v578_v49 = vadd.f32 %v577_v47, %v1859_v55  ;;  %v968_v50 = vpop.f32.mrb[19].mxu1  ;;  %v977_v53 = vadd.f32 %v1639_v46, %v1861_v56 }
 0x11e   : > { %v1046_v51 = vadd.f32 %v974_v39, %v655_v43  ;;  %v656_v52 = vmax.f32 %v586_v45, 0.0  ;;  %v969_v58 = vadd.f32 %v968_v50, %v1861_v56 }
 0x11f   : > { %v1044_v54 = vadd.f32 %v966_v44, %v653_v48  ;;  %v654_v57 = vmax.f32 %v578_v49, 0.0 }
 0x120   : > { %v1047_v59 = vadd.f32 %v977_v53, %v656_v52 }
 0x121   : > { %v1045_v60 = vadd.f32 %v969_v58, %v654_v57  ;;  %v1594_v61 = vpop.f32.mrb[20].mxu0 }
 0x122   : > { %v1461_v62 = vpack.c.bf16 %v1047_v59, %v1046_v51  ;;  %v599_v63 = vadd.f32 %v1594_v61, %v1859_v55  ;;  %v1642_v0 = vpop.f32.mrb[20].mxu1  ;;  %v590_v1 = vpop.f32.mrb[21].mxu0 }
 0x123   : > { %v1456_v2 = vpack.c.bf16 %v1045_v60, %v1044_v54  ;;  %v990_v3 = vadd.f32 %v1642_v0, %v1861_v56  ;;  %v591_v4 = vadd.f32 %v590_v1, %v1859_v55  ;;  %v981_v5 = vpop.f32.mrb[21].mxu1  ;;  %v1595_v6 = vpop.f32.mrb[22].mxu0 }
 0x124   : > { %1501 = vst [vmem:[%s1875_s24 + $0x48] sm:$0xff] %v1461_v62   ;;  %v659_v7 = vmax.f32 %v599_v63, 0.0  ;;  %v982_v8 = vadd.f32 %v981_v5, %v1861_v56  ;;  %v602_v9 = vadd.f32 %v1595_v6, %v1859_v55  ;;  %v1643_v10 = vpop.f32.mrb[22].mxu1  ;;  %v593_v11 = vpop.f32.mrb[23].mxu0 }
 0x125   : > { %1500 = vst [vmem:[%s1875_s24 + $0x40] sm:$0xff] %v1456_v2   ;;  %v657_v12 = vmax.f32 %v591_v4, 0.0  ;;  %v594_v13 = vadd.f32 %v593_v11, %v1859_v55  ;;  %v984_v14 = vpop.f32.mrb[23].mxu1  ;;  %v993_v17 = vadd.f32 %v1643_v10, %v1861_v56 }
 0x126   : > { %v1050_v15 = vadd.f32 %v990_v3, %v659_v7  ;;  %v660_v16 = vmax.f32 %v602_v9, 0.0  ;;  %v985_v20 = vadd.f32 %v984_v14, %v1861_v56 }
 0x127   : > { %v1048_v18 = vadd.f32 %v982_v8, %v657_v12  ;;  %v658_v19 = vmax.f32 %v594_v13, 0.0 }
 0x128   : > { %v1051_v21 = vadd.f32 %v993_v17, %v660_v16 }
 0x129   : > { %v1049_v22 = vadd.f32 %v985_v20, %v658_v19  ;;  %v1598_v23 = vpop.f32.mrb[24].mxu0 }
 0x12a   : > { %v1471_v24 = vpack.c.bf16 %v1051_v21, %v1050_v15  ;;  %v615_v25 = vadd.f32 %v1598_v23, %v1859_v55  ;;  %v1646_v26 = vpop.f32.mrb[24].mxu1  ;;  %v606_v27 = vpop.f32.mrb[25].mxu0 }
 0x12b   : > { %v1466_v28 = vpack.c.bf16 %v1049_v22, %v1048_v18  ;;  %v1006_v29 = vadd.f32 %v1646_v26, %v1861_v56  ;;  %v607_v30 = vadd.f32 %v606_v27, %v1859_v55  ;;  %v997_v31 = vpop.f32.mrb[25].mxu1  ;;  %v1599_v32 = vpop.f32.mrb[26].mxu0 }
 0x12c   : > { %1503 = vst [vmem:[%s1875_s24 + $0x58] sm:$0xff] %v1471_v24   ;;  %v663_v33 = vmax.f32 %v615_v25, 0.0  ;;  %v998_v34 = vadd.f32 %v997_v31, %v1861_v56  ;;  %v618_v35 = vadd.f32 %v1599_v32, %v1859_v55  ;;  %v1647_v36 = vpop.f32.mrb[26].mxu1  ;;  %v609_v37 = vpop.f32.mrb[27].mxu0 }
 0x12d   : > { %1502 = vst [vmem:[%s1875_s24 + $0x50] sm:$0xff] %v1466_v28   ;;  %v661_v38 = vmax.f32 %v607_v30, 0.0  ;;  %v610_v39 = vadd.f32 %v609_v37, %v1859_v55  ;;  %v1000_v40 = vpop.f32.mrb[27].mxu1  ;;  %v1009_v43 = vadd.f32 %v1647_v36, %v1861_v56 }
 0x12e   : > { %v1054_v41 = vadd.f32 %v1006_v29, %v663_v33  ;;  %v664_v42 = vmax.f32 %v618_v35, 0.0  ;;  %v1001_v46 = vadd.f32 %v1000_v40, %v1861_v56 }
 0x12f   : > { %v1052_v44 = vadd.f32 %v998_v34, %v661_v38  ;;  %v662_v45 = vmax.f32 %v610_v39, 0.0 }
 0x130   : > { %v1055_v47 = vadd.f32 %v1009_v43, %v664_v42 }
 0x131   : > { %v1053_v48 = vadd.f32 %v1001_v46, %v662_v45  ;;  %v1602_v49 = vpop.f32.mrb[28].mxu0 }
 0x132   : > { %v1481_v50 = vpack.c.bf16 %v1055_v47, %v1054_v41  ;;  %v631_v51 = vadd.f32 %v1602_v49, %v1859_v55  ;;  %v1650_v52 = vpop.f32.mrb[28].mxu1  ;;  %v622_v53 = vpop.f32.mrb[29].mxu0 }
 0x133   : > { %v1476_v54 = vpack.c.bf16 %v1053_v48, %v1052_v44  ;;  %v1022_v57 = vadd.f32 %v1650_v52, %v1861_v56  ;;  %v623_v58 = vadd.f32 %v622_v53, %v1859_v55  ;;  %v1013_v59 = vpop.f32.mrb[29].mxu1  ;;  %v1603_v60 = vpop.f32.mrb[30].mxu0 }
 0x134   : > { %1505 = vst [vmem:[%s1875_s24 + $0x68] sm:$0xff] %v1481_v50   ;;  %v667_v61 = vmax.f32 %v631_v51, 0.0  ;;  %v1014_v62 = vadd.f32 %v1013_v59, %v1861_v56  ;;  %v634_v63 = vadd.f32 %v1603_v60, %v1859_v55  ;;  %v1651_v0 = vpop.f32.mrb[30].mxu1  ;;  %v625_v1 = vpop.f32.mrb[31].mxu0 }
 0x135   : > { %1504 = vst [vmem:[%s1875_s24 + $0x60] sm:$0xff] %v1476_v54   ;;  %v665_v2 = vmax.f32 %v623_v58, 0.0  ;;  %v626_v3 = vadd.f32 %v625_v1, %v1859_v55  ;;  %v1016_v4 = vpop.f32.mrb[31].mxu1  ;;  %v1025_v7 = vadd.f32 %v1651_v0, %v1861_v56 }
 0x136   : > { %v1058_v5 = vadd.f32 %v1022_v57, %v667_v61  ;;  %v668_v6 = vmax.f32 %v634_v63, 0.0  ;;  %v1017_v10 = vadd.f32 %v1016_v4, %v1861_v56 }
 0x137   : > { %v1056_v8 = vadd.f32 %v1014_v62, %v665_v2  ;;  %v666_v9 = vmax.f32 %v626_v3, 0.0 }
 0x138   : > { %v1059_v11 = vadd.f32 %v1025_v7, %v668_v6 }
 0x139   : > { %v1057_v12 = vadd.f32 %v1017_v10, %v666_v9 }
 0x13a   : > { %v1491_v13 = vpack.c.bf16 %v1059_v11, %v1058_v5 }
 0x13b   : > { %v1486_v14 = vpack.c.bf16 %v1057_v12, %v1056_v8 }
 0x13c   : > { %1507 = vst [vmem:[%s1875_s24 + $0x78] sm:$0xff] %v1491_v13  }
 0x13d   : > { %1506 = vst [vmem:[%s1875_s24 + $0x70] sm:$0xff] %v1486_v14  }
 0x13e PF: > { %s16_s21 = sadd.s32 1, %s1714_s21  }
 0x13f   : > { %p13_p4 = scmp.ge.s32.totalorder %s16_s21, 4  }
 0x141   :  { %15 = sbr.rel (!%p13_p4) target bundleno = 1 (0x1), region = 77 }

// kernel: bottleneck_forward.4
= control target key start
LH: loop header
LB: loop body
LE: loop exit
PB: predicated region body
PF: predicated region fallthrough
CT: control target
= control target key end

     0   :  { %s3345_s21 = smov 0   ;;  %s3347_s22 = smov 0   ;;  %s4072_s0 = inlined_call_operand.vmem [shape: bf16[2,342,128], index: 0, kind: input, shape index: {}]   ;;  %s4073_s1 = inlined_call_operand.vmem [shape: bf16[2,19,18,128], index: 1, kind: input, shape index: {}, may-alias: {1,2,3}]   ;;  %s4074_s2 = inlined_call_operand.vmem [shape: bf16[2,19,18,128], index: 2, kind: input, shape index: {}, may-alias: {1,2,3}]   ;;  %s4075_s3 = inlined_call_operand.vmem [shape: bf16[2,19,18,128], index: 3, kind: input, shape index: {}, may-alias: {1,2,3}]   ;;  %s4076_s4 = inlined_call_operand.vmem [shape: bf16[9,128,128], index: 4, kind: input, shape index: {}]   ;;  %s4077_s5 = inlined_call_operand.vmem [shape: bf16[1,128], index: 5, kind: input, shape index: {}]   ;;  %s4078_s6 = inlined_call_operand.vmem [shape: bf16[2,16,16,128], index: 6, kind: output, shape index: {}]  }
   0x1   :  { %s3349_s23 = smov 0   ;;  %s3351_s24 = smov 0  }
   0x2   :  { %s3353_s25 = smov 0  }
   0x3 LB: > { %s25_s26 = sadd.s32 1, %s3298_s23  ;;  %s28_s27 = sadd.s32 1, %s3302_s24  ;;  %s3306_s25 = sphi %s3353_s25, %s16_s25   ;;  %s3302_s24 = sphi %s3351_s24, %s4089_s24   ;;  %s3298_s23 = sphi %s3349_s23, %s4088_s23   ;;  %s3294_s22 = sphi %s3347_s22, %s4087_s22   ;;  %s3290_s21 = sphi %s3345_s21, %s4086_s21  }
   0x4   : > { %p26_p0 = scmp.ge.s32.totalorder %s25_s26, 4  ;;  %p2415_p1 = scmp.ge.s32.totalorder %s3306_s25, 1 }
   0x5   : > { %p337_p2 = scmp.lt.s32.totalorder %s3306_s25, 9 }
   0x6   : > { %s4091_s26 = smov (%p26_p0, %s25_s26), 0  ;;  %s4093_s27 = smov (!%p26_p0, %s28_s27), %s3302_s24 }
   0x7   : > { %p338_p3 = pnand %p2415_p1, %p337_p2  ;;  %p30_p4 = scmp.ge.s32.totalorder %s4093_s27, 2 }
   0x8   : > { %v3185_v0 = vld [vmem:[%s4076_s4 + $0x40] sm:$0xff] (!%p338_p3)   ;;  %v3308_v1 = vmov (!%p338_p3), 0.0   ;;  %v3187_v3 = vld [vmem:[%s4076_s4 + $0x48] sm:$0xff] (!%p338_p3)   ;;  %vm3309_vm0 = vmmov (!%p338_p3), 0   ;;  %s419_s10 = smul.u32 (!%p338_p3), 9, %s3290_s21  ;;  %p424_p5 = scmp.lt.s32.totalorder (!%p338_p3), %s3294_s22, 1 }
   0x9   : > { %s4095_s27 = smov (%p30_p4, %s4093_s27), 0  ;;  %341 = sbr.rel (%p338_p3) target bundleno = 446 (0x1be), region = 44 }
   0xa   : > { %2798 = vmatprep.subr.bf16.mxu0 (!%p338_p3), %v3308_v1  ;;  %2834 = vmatprep.subr.bf16.mxu1 (!%p338_p3), %v3308_v1  ;;  %v3186_v2 = vld [vmem:[%s4076_s4] sm:$0xff] (!%p338_p3)   ;;  %v3188_v4 = vld [vmem:[%s4076_s4 + $0x8] sm:$0xff] (!%p338_p3)   ;;  %p426_p6 = scmp.lt.s32.totalorder (!%p338_p3), %s419_s10, 42  ;;  %v3189_v5 = vld [vmem:[%s4076_s4 + $0x50] sm:$0xff] (!%p338_p3)   ;;  %s3414_s18 = sshll.u32 (!%p338_p3), %s3290_s21, 2  ;;  %vm587_vm2 = vcmask (!%p338_p3), 1045504  }
   0xb   : > { %2799 = vmatpush3.bf16.msra.mxu0 (!%p338_p3), %v3185_v0  ;;  %2814 = vmatprep.mubr.msk.bf16.mxu0 (!%p338_p3), %vm3309_vm0, %v3308_v1  ;;  %v3190_v6 = vld [vmem:[%s4076_s4 + $0x10] sm:$0xff] (!%p338_p3)   ;;  %v3191_v7 = vld [vmem:[%s4076_s4 + $0x58] sm:$0xff] (!%p338_p3)   ;;  %s438_s29 = sadd.s32 (!%p338_p3), 4, %s3414_s18  ;;  %v3193_v9 = vld [vmem:[%s4076_s4 + $0x60] sm:$0xff] (!%p338_p3)   ;;  %vm633_vm1 = vsmask.f32 (!%p338_p3), 7424 }
   0xc   : > { %2835 = vmatpush3.bf16.msra.mxu1 (!%p338_p3), %v3186_v2  ;;  %2800 = vmatprep.subr.bf16.mxu0 (!%p338_p3), %v3308_v1  ;;  %v3192_v8 = vld [vmem:[%s4076_s4 + $0x18] sm:$0xff] (!%p338_p3)   ;;  %p3424_p7 = scmp.lt.s32.totalorder (!%p338_p3), %s438_s29, 18  ;;  %v3194_v10 = vld [vmem:[%s4076_s4 + $0x20] sm:$0xff] (!%p338_p3)   ;;  %v3195_v13 = vld [vmem:[%s4076_s4 + $0x68] sm:$0xff] (!%p338_p3)   ;;  %vm1273_vm3 = vsmask.f32 (!%p338_p3), 6400 }
   0xd   : > { %2836 = vmatprep.subr.bf16.mxu1 (!%p338_p3), %v3308_v1  ;;  %2850 = vmatprep.mubr.msk.bf16.mxu1 (!%p338_p3), %vm3309_vm0, %v3308_v1  ;;  %v3196_v14 = vld [vmem:[%s4076_s4 + $0x28] sm:$0xff] (!%p338_p3)   ;;  %v3197_v16 = vld [vmem:[%s4076_s4 + $0x70] sm:$0xff] (!%p338_p3)   ;;  %v3199_v22 = vld [vmem:[%s4076_s4 + $0x78] sm:$0xff] (!%p338_p3)   ;;  %s455_s30 = sadd.s32 (!%p338_p3), 5, %s3414_s18  ;;  %vm941_vm4 = vcmask (!%p338_p3), 1046528   ;;  %s472_s15 = sadd.s32 (!%p338_p3), 6, %s3414_s18 }
   0xe   : > { %v3198_v21 = vld [vmem:[%s4076_s4 + $0x30] sm:$0xff] (!%p338_p3)   ;;  %v3200_v24 = vld [vmem:[%s4076_s4 + $0x38] sm:$0xff] (!%p338_p3)   ;;  %v3203_v27 = vld [vmem:[%s4076_s4 + $0x80] sm:$0xff] (!%p338_p3)   ;;  %p3624_p8 = scmp.lt.s32.totalorder (!%p338_p3), %s455_s30, 18  ;;  %p3671_p9 = scmp.lt.s32.totalorder (!%p338_p3), %s472_s15, 18  ;;  %vm568_vm5 = vcmask (!%p338_p3), 1044480  }
   0xf   : > { %2801 = vmatpush3.bf16.msra.mxu0 (!%p338_p3), %v3187_v3  ;;  %v3206_v33 = vld [vmem:[%s4076_s4 + $0xc0] sm:$0xff] (!%p338_p3)   ;;  %v3204_v34 = vld [vmem:[%s4076_s4 + $0x88] sm:$0xff] (!%p338_p3)   ;;  %v3207_v39 = vld [vmem:[%s4076_s4 + $0x90] sm:$0xff] (!%p338_p3)   ;;  %vm1803_vm6 = vsmask.f32 (!%p338_p3), 5376  ;;  %p491_p10 = scmp.lt.s32.totalorder (!%p338_p3), %s3414_s18, 15 }
  0x10   : > { %s4097_s22 = smov (!%p424_p5, %s3294_s22), 1  ;;  %s4099_s10 = smov (!%p426_p6, %s419_s10), 42  ;;  %2837 = vmatpush3.bf16.msra.mxu1 %v3188_v4  ;;  %2802 = vmatprep.subr.bf16.mxu0 %v3308_v1  ;;  %v3208_v37 = vld [vmem:[%s4076_s4 + $0xc8] sm:$0xff]   ;;  %v3211_v42 = vld [vmem:[%s4076_s4 + $0xd0] sm:$0xff]   ;;  %v3210_v45 = vld [vmem:[%s4076_s4 + $0x98] sm:$0xff]   ;;  %vm2231_vm7 = vcmask 1040384  }
  0x11   : > { %s3138_s17 = smul.u32 43, %s4097_s22  ;;  %2838 = vmatprep.subr.bf16.mxu1 %v3308_v1  ;;  %s4101_s29 = smov (!%p3424_p7, %s438_s29), 18  ;;  %v3213_v47 = vld [vmem:[%s4076_s4 + $0xd8] sm:$0xff]   ;;  %v3212_v48 = vld [vmem:[%s4076_s4 + $0xa0] sm:$0xff]   ;;  %v3217_v59 = vld [vmem:[%s4076_s4 + $0xa8] sm:$0xff]   ;;  %vm2232_vm8 = vcmask 1044484  }
  0x12   : > { %s4103_s29 = smov (!%p3424_p7, %s4101_s29), 18  ;;  %s3451_s16 = smul.u32 57, %s4097_s22  ;;  %v3216_v52 = vld [vmem:[%s4076_s4 + $0xe0] sm:$0xff]   ;;  %v3218_v60 = vld [vmem:[%s4076_s4 + $0xe8] sm:$0xff]   ;;  %vm4025_vm9 = vmor %vm2231_vm7, %vm2232_vm8  ;;  %vm2191_vm10 = vcmask 1042432   ;;  %vm2192_vm11 = vcmask 1046532  }
  0x13   : > { %s429_s28 = sadd.s32 %s3138_s17, %s4099_s10  ;;  %2803 = vmatpush3.bf16.msra.mxu0 %v3189_v5  ;;  %s3139_s20 = smul.u32 3, %s4103_s29  ;;  %v3219_v5 = vld [vmem:[%s4076_s4 + $0xb0] sm:$0xff]   ;;  %vm4038_vm12 = vmor %vm2191_vm10, %vm2192_vm11  ;;  %vm2211_vm13 = vcmask 1041408   ;;  %vm2212_vm14 = vcmask 1045508  }
  0x14   : > { %2839 = vmatpush3.bf16.msra.mxu1 %v3190_v6  ;;  %2804 = vmatprep.subr.bf16.mxu0 %v3308_v1  ;;  %s2416_s8 = sshll.u32 %s429_s28, 2  ;;  %s4105_s30 = smov (!%p3624_p8, %s455_s30), 18  ;;  %vm2213_vm15 = vmor %vm2211_vm13, %vm2212_vm14 }
  0x15   : > { %2840 = vmatprep.subr.bf16.mxu1 %v3308_v1  ;;  %s3437_s13 = scalar_lea.vmem %s4072_s0, %s2416_s8  ;;  %s447_s29 = sadd.s32 %s3451_s16, %s3139_s20 }
  0x16   : > { %v3201_v11 = vld [vmem:[%s3437_s13] sm:$0xff]   ;;  %v3448_v12 = vld [vmem:[%s3437_s13 + $0x8] sm:$0xff]   ;;  %v3466_v18 = vld [vmem:[%s3437_s13 + $0x10] sm:$0xff]   ;;  %s2421_s12 = sshll.u32 %s447_s29, 2  ;;  %s4107_s30 = smov (!%p3624_p8, %s4105_s30), 18 }
  0x17   : > { %2805 = vmatpush3.bf16.msra.mxu0 %v3191_v7  ;;  %537 = vst [vmem:[#allocation2] sm:$0xff] %v3201_v11  ;;  %538 = vst [vmem:[#allocation2 + $0x8] sm:$0xff] %v3448_v12  ;;  %v637_v15 = vshll.u32 %v3201_v11, 16  ;;  %v635_v17 = vshrl.u32 %v3201_v11, 16  ;;  %v642_v20 = vshll.u32 %v3448_v12, 16  ;;  %v3480_v23 = vld [vmem:[%s3437_s13 + $0x18] sm:$0xff]   ;;  %s3489_s20 = scalar_lea.vmem %s4073_s1, %s2421_s12 }
  0x18   : > { %2841 = vmatpush3.bf16.msra.mxu1 %v3192_v8  ;;  %2806 = vmatprep.subr.bf16.mxu0 %v3308_v1  ;;  %539 = vst [vmem:[#allocation2 + $0x10] sm:$0xff] %v3466_v18  ;;  %v646_v28 = vshrl.u32 %v3448_v12, 16  ;;  %v650_v29 = vshll.u32 %v3466_v18, 16  ;;  %v3499_v31 = vld [vmem:[%s3437_s13 + $0x20] ss:$0 sps:$4 sm:$0xff]   ;;  %v654_v40 = vshrl.u32 %v3466_v18, 16 }
  0x19   : > { %2842 = vmatprep.subr.bf16.mxu1 %v3308_v1  ;;  %v639_v19 = vrot.slane %v637_v15, 1  ;;  %v644_v26 = vrot.slane %v642_v20, 1  ;;  %v3215_v32 = vld [vmem:[%s3489_s20] ss:$0 sps:$4 sm:$0xff]   ;;  %541 = vst [vmem:[#allocation2 + $0x20] sm:$0xf] %v3499_v31 }
  0x1a   : > { %555 = vst [vmem:[#allocation2 + $0x20] sm:$0xf0] %v3215_v32  ;;  %v652_v36 = vrot.slane %v650_v29, 1  ;;  %v3526_v41 = vshll.u32 %v3480_v23, 16  ;;  %v3554_v50 = vshrl.u32 %v3480_v23, 16  ;;  %v1285_v53 = vrot.slane %v654_v40, 1 }
  0x1b   : > { %2807 = vmatpush3.bf16.msra.mxu0 %v3193_v9  ;;  %v640_v25 = vor.u32 %v639_v19, %v635_v17  ;;  %v648_v35 = vor.u32 %v646_v28, %v644_v26  ;;  %v1288_v54 = vrot.slane %v650_v29, 2  ;;  %v3232_v56 = vld [vmem:[%s3489_s20 + $0x4] sm:$0x1f]   ;;  %v1473_v62 = vrot.slane %v3466_v18, 2  ;;  %v3220_v7 = vld [vmem:[%s4076_s4 + $0xf0] sm:$0xff]   ;;  %v3221_v9 = vld [vmem:[%s4076_s4 + $0xb8] sm:$0xff]  }
  0x1c   : > { %2843 = vmatpush3.bf16.msra.mxu1 %v3194_v10  ;;  %2808 = vmatprep.subr.bf16.mxu0 %v3308_v1  ;;  %v656_v43 = vor.u32 %v654_v40, %v652_v36  ;;  %v660_v44 = vrot.slane %v3526_v41, 1  ;;  %v1294_v55 = vrot.slane %v3554_v50, 1  ;;  %556 = vst [vmem:[#allocation2 + $0x28] sm:$0x1f] %v3232_v56  ;;  %v1297_v61 = vrot.slane %v3526_v41, 2  ;;  %v3222_v10 = vld [vmem:[%s4076_s4 + $0xf8] sm:$0xff]  }
  0x1d   : > { %2844 = vmatprep.subr.bf16.mxu1 %v3308_v1  ;;  %v645_v30 = vsel %vm633_vm1, %v640_v25, %v644_v26  ;;  %v653_v38 = vsel %vm633_vm1, %v648_v35, %v652_v36  ;;  %v3580_v63 = vrot.slane %v3480_v23, 2  ;;  %v3583_v0 = vor.u32 %v1288_v54, %v1285_v53  ;;  %s3141_s8 = smul.u32 3, %s4107_s30  ;;  %v3225_v26 = vld [vmem:[%s4076_s4 + $0x140] sm:$0xff]   ;;  %v3224_v28 = vld [vmem:[%s4076_s4 + $0x108] sm:$0xff]   ;;  %v3226_v32 = vld [vmem:[%s4076_s4 + $0x110] sm:$0xff]   ;;  %s4109_s15 = smov (!%p3671_p9, %s472_s15), 18 }
  0x1e   : > { %v661_v49 = vsel %vm633_vm1, %v656_v43, %v660_v44  ;;  %v664_v57 = vor.u32 %v3554_v50, %v660_v44  ;;  %v3585_v2 = vor.u32 %v1297_v61, %v1294_v55  ;;  %v1815_v15 = vrot.slane %v3554_v50, 2  ;;  %v3229_v36 = vld [vmem:[%s4076_s4 + $0x150] sm:$0xff]   ;;  %s4111_s15 = smov (!%p3671_p9, %s4109_s15), 18  ;;  %v3234_v54 = vld [vmem:[%s4076_s4 + $0x128] sm:$0xff]   ;;  %s4113_s18 = smov (!%p491_p10, %s3414_s18), 15 }
  0x1f   : > { %2809 = vmatpush3.bf16.msra.mxu0 %v3195_v13  ;;  %v3592_v4 = vsel %vm587_vm2, %v1473_v62, %v3580_v63  ;;  %v918_v13 = vld [vmem:[#allocation2] sm:$0xfe]  ;;  %v1818_v17 = vrot.slane %v3526_v41, 3  ;;  %s464_s13 = sadd.s32 %s3141_s8, %s3451_s16  ;;  %v3666_v29 = vrot.slane %v3480_v23, 1  ;;  %s3142_s20 = smul.u32 3, %s4111_s15  ;;  %v3231_v41 = vld [vmem:[%s4076_s4 + $0x158] sm:$0xff]  }
  0x20   : > { %2845 = vmatpush3.bf16.msra.mxu1 %v3196_v14  ;;  %2810 = vmatprep.subr.bf16.mxu0 %v3308_v1  ;;  %v3601_v6 = vsel %vm1273_vm3, %v3583_v0, %v3585_v2  ;;  %v3622_v14 = vld [vmem:[#allocation2 + $0x8] sm:$0xfe]  ;;  %v942_v19 = vrot.slane %v918_v13, 1  ;;  %s2426_s9 = sshll.u32 %s464_s13, 2  ;;  %v1982_v43 = vld [vmem:[#allocation2 + $0x10] sm:$0xf8] }
  0x21   : > { %2846 = vmatprep.subr.bf16.mxu1 %v3308_v1  ;;  %v3542_v46 = vld [vmem:[#allocation2 + $0x20] sm:$0x1f]  ;;  %v1112_v20 = vrot.slane %v3622_v14, 1  ;;  %s466_s14 = scalar_lea.vmem %s4074_s2, %s2426_s9  ;;  %v2003_v44 = vrot.slane %v3480_v23, 3  ;;  %s2434_s28 = sshll.u32 %s4097_s22, 5 }
  0x22   : > { %v666_v51 = vshll.u32 %v3542_v46, 16  ;;  %v670_v8 = vshrl.u32 %v3542_v46, 16  ;;  %v3685_v35 = vld [vmem:[#allocation2 + $0x20] sm:$0xff]  ;;  %v949_v53 = vrot.slane %v3542_v46, 1  ;;  %v3235_v46 = vld [vmem:[%s4076_s4 + $0x168] sm:$0xff]  }
  0x23   : > { %2811 = vmatpush3.bf16.msra.mxu0 %v3197_v16  ;;  %v943_v16 = vrot.slane %v3448_v12, 1  ;;  %v1117_v40 = vrot.slane %v3685_v35, 1  ;;  %v2005_v56 = vrot.slane %v3685_v35, 3 }
  0x24   : > { %2847 = vmatpush3.bf16.msra.mxu1 %v3198_v21  ;;  %2812 = vmatprep.subr.bf16.mxu0 %v3308_v1  ;;  %v668_v58 = vrot.slane %v666_v51, 1  ;;  %v3644_v21 = vor.u32 %v1818_v17, %v1815_v15  ;;  %v950_v61 = vsel %vm941_vm4, %v3666_v29, %v949_v53 }
  0x25   : > { %2848 = vmatprep.subr.bf16.mxu1 %v3308_v1 }
  0x26   : > { %v669_v3 = vsel %vm633_vm1, %v664_v57, %v668_v58 }
  0x27   : > { %2813 = vmatpush3.bf16.msra.mxu0 %v3199_v22  ;;  %v944_v22 = vsel %vm941_vm4, %v942_v19, %v943_v16 }
  0x28   : > { %2849 = vmatpush3.bf16.msra.mxu1 %v3200_v24  ;;  %2870 = vmatprep.subr.bf16.mxu0 %v3308_v1  ;;  %v3223_v24 = vld [vmem:[%s4076_s4 + $0x100] sm:$0xff]  }
  0x29   : > { %2906 = vmatprep.subr.bf16.mxu1 %v3308_v1 }
  0x2a   : > { %2815 = vmatmul.mubr.bf16.vlgmr.msra.gmra.mrb[0].mxu0 %v645_v30  ;;  %v3227_v30 = vld [vmem:[%s4076_s4 + $0x148] sm:$0xff]  }
  0x2b   : > { %2851 = vmatmul.mubr.bf16.vlgmr.msra.gmra.mrb[0].mxu1 %v3201_v11  ;;  %2871 = vmatpush3.bf16.msra.mxu0 %v3203_v27  ;;  %v672_v11 = vor.u32 %v670_v8, %v668_v58  ;;  %v3249_v27 = vld [vmem:[%s466_s14] sm:$0xff]   ;;  %v1275_v8 = vshrl.u32 %v3622_v14, 16 }
  0x2c   : > { %2872 = vmatprep.subr.bf16.mxu0 %v3308_v1  ;;  %2818 = vmatprep.mubr.msk.bf16.mxu0 %vm3309_vm0, %v3308_v1 }
  0x2d   : > { %2854 = vmatprep.mubr.msk.bf16.mxu1 %vm3309_vm0, %v3308_v1  ;;  %2907 = vmatpush3.bf16.msra.mxu1 %v3206_v33  ;;  %v1277_v13 = vrot.slane %v1275_v8, 1 }
  0x2e   : > { %2908 = vmatprep.subr.bf16.mxu1 %v3308_v1 }
  0x2f   : > { %2873 = vmatpush3.bf16.msra.mxu0 %v3204_v34 }
  0x30   : > { %2874 = vmatprep.subr.bf16.mxu0 %v3308_v1 }
  0x31   : > { %2909 = vmatpush3.bf16.msra.mxu1 %v3208_v37  ;;  %v3262_v37 = vld [vmem:[%s466_s14 + $0x8] ss:$0 sps:$4 sm:$0x11]   ;;  %s481_s14 = sadd.s32 %s3142_s20, %s3451_s16 }
  0x32   : > { %2819 = vmatmul.mubr.bf16.gmra.mrb[4].mxu0 %v653_v38  ;;  %2910 = vmatprep.subr.bf16.mxu1 %v3308_v1  ;;  %v3228_v38 = vld [vmem:[%s4076_s4 + $0x118] sm:$0xff]   ;;  %s2431_s15 = sshll.u32 %s481_s14, 2 }
  0x33   : > { %2855 = vmatmul.mubr.bf16.gmra.mrb[4].mxu1 %v3448_v12  ;;  %2875 = vmatpush3.bf16.msra.mxu0 %v3207_v39  ;;  %v1113_v12 = vrot.slane %v3466_v18, 1  ;;  %v570_v39 = vrot.slane %v3262_v37, 3  ;;  %s483_s16 = scalar_lea.vmem %s4075_s3, %s2431_s15  ;;  %s2433_s15 = sshll.u32 %s4113_s18, 1 }
  0x34   : > { %2822 = vmatprep.mubr.msk.bf16.mxu0 %vm3309_vm0, %v3308_v1  ;;  %2858 = vmatprep.mubr.msk.bf16.mxu1 %vm3309_vm0, %v3308_v1  ;;  %s495_s30 = sadd.s32 %s2434_s28, %s2433_s15 }
  0x35   : > { %2876 = vmatprep.subr.bf16.mxu0 %v3308_v1  ;;  %2911 = vmatpush3.bf16.msra.mxu1 %v3211_v42  ;;  %v1114_v25 = vsel %vm941_vm4, %v1112_v20, %v1113_v12  ;;  %v946_v33 = vsel %vm941_vm4, %v943_v16, %v1113_v12  ;;  %v1116_v34 = vsel %vm941_vm4, %v1113_v12, %v3666_v29  ;;  %v3240_v20 = vld [vmem:[%s4076_s4 + $0x180] sm:$0xff]   ;;  %s2435_s18 = sshll.u32 %s495_s30, 2 }
  0x36   : > { %2912 = vmatprep.subr.bf16.mxu1 %v3308_v1  ;;  %s4021_s8 = scalar_lea.vmem %s4078_s6, %s2435_s18 }
  0x37   : > { %2877 = vmatpush3.bf16.msra.mxu0 %v3210_v45  ;;  %v3230_v45 = vld [vmem:[%s4076_s4 + $0x120] sm:$0xff]  }
  0x38   : > { %2878 = vmatprep.subr.bf16.mxu0 %v3308_v1 }
  0x39   : > { %2913 = vmatpush3.bf16.msra.mxu1 %v3213_v47  ;;  %v2002_v47 = vrot.slane %v1982_v43, 3  ;;  %v3252_v43 = vld [vmem:[%s4076_s4 + $0x1e8] sm:$0xff]  }
  0x3a   : > { %2823 = vmatmul.mubr.bf16.gmra.mrb[8].mxu0 %v661_v49  ;;  %2914 = vmatprep.subr.bf16.mxu1 %v3308_v1  ;;  %v1089_v49 = vld [vmem:[#allocation2 + $0x28] sm:$0x1f] }
  0x3b   : > { %2859 = vmatmul.mubr.bf16.gmra.mrb[8].mxu1 %v3466_v18  ;;  %2879 = vmatpush3.bf16.msra.mxu0 %v3212_v48  ;;  %v1118_v48 = vsel %vm941_vm4, %v3666_v29, %v1117_v40  ;;  %v3726_v51 = vsel %vm568_vm5, %v2002_v47, %v2003_v44  ;;  %v1119_v57 = vrot.slane %v1089_v49, 1  ;;  %v3244_v18 = vld [vmem:[%s4076_s4 + $0x1c8] sm:$0xff]   ;;  %v3246_v29 = vld [vmem:[%s4076_s4 + $0x1d0] sm:$0xff]  }
  0x3c   : > { %2826 = vmatprep.mubr.msk.bf16.mxu0 %vm3309_vm0, %v3308_v1  ;;  %2862 = vmatprep.mubr.msk.bf16.mxu1 %vm3309_vm0, %v3308_v1  ;;  %v3253_v47 = vld [vmem:[%s4076_s4 + $0x1b0] sm:$0xff]  }
  0x3d   : > { %2880 = vmatprep.subr.bf16.mxu0 %v3308_v1  ;;  %2915 = vmatpush3.bf16.msra.mxu1 %v3216_v52  ;;  %v3263_v52 = vld [vmem:[%s483_s16] sm:$0xff]   ;;  %v1615_v49 = vld [vmem:[#allocation2 + $0x10] sm:$0xfc] }
  0x3e   : > { %2916 = vmatprep.subr.bf16.mxu1 %v3308_v1  ;;  %v588_v58 = vrot.slane %v3263_v52, 2  ;;  %v1805_v52 = vshrl.u32 %v1615_v49, 16 }
  0x3f   : > { %2881 = vmatpush3.bf16.msra.mxu0 %v3217_v59  ;;  %v3744_v59 = vsel %vm568_vm5, %v2003_v44, %v2005_v56 }
  0x40   : > { %2882 = vmatprep.subr.bf16.mxu0 %v3308_v1  ;;  %593 = vst [vmem:[#allocation2 + $0x30] sm:$0xc0] %v588_v58  ;;  %v1642_v58 = vrot.slane %v1615_v49, 2 }
  0x41   : > { %2917 = vmatpush3.bf16.msra.mxu1 %v3218_v60 }
  0x42   : > { %2827 = vmatmul.mubr.bf16.gmra.mrb[12].mxu0 %v669_v3  ;;  %2918 = vmatprep.subr.bf16.mxu1 %v3308_v1  ;;  %v1120_v3 = vsel %vm941_vm4, %v1117_v40, %v1119_v57  ;;  %v3250_v40 = vld [vmem:[%s4076_s4 + $0x1e0] sm:$0xff]  }
  0x43   : > { %2863 = vmatmul.mubr.bf16.gmra.mrb[12].mxu1 %v3480_v23  ;;  %2830 = vmatprep.mubr.msk.bf16.mxu0 %vm3309_vm0, %v3308_v1  ;;  %v3233_v23 = vld [vmem:[%s4076_s4 + $0x160] sm:$0xff]  }
  0x44   : > { %2866 = vmatprep.mubr.msk.bf16.mxu1 %vm3309_vm0, %v3308_v1  ;;  %2883 = vmatpush3.bf16.msra.mxu0 %v3219_v5  ;;  %v3236_v5 = vld [vmem:[%s4076_s4 + $0x130] sm:$0xff]  }
  0x45   : > { %2919 = vmatpush3.bf16.msra.mxu1 %v3220_v7  ;;  %2884 = vmatprep.subr.bf16.mxu0 %v3308_v1  ;;  %v3237_v7 = vld [vmem:[%s4076_s4 + $0x170] sm:$0xff]  }
  0x46   : > { %2920 = vmatprep.subr.bf16.mxu1 %v3308_v1 }
  0x48   : > { %2885 = vmatpush3.bf16.msra.mxu0 %v3221_v9  ;;  %v1278_v9 = vshll.u32 %v3622_v14, 16  ;;  %v1452_v14 = vld [vmem:[#allocation2 + $0x8] sm:$0xfc] }
  0x49   : > { %2921 = vmatpush3.bf16.msra.mxu1 %v3222_v10  ;;  %2942 = vmatprep.subr.bf16.mxu0 %v3308_v1  ;;  %v3238_v10 = vld [vmem:[%s4076_s4 + $0x138] sm:$0xff]   ;;  %v1472_v17 = vrot.slane %v1452_v14, 2 }
  0x4a   : > { %2831 = vmatmul.mubr.bf16.gmra.mrb[16].mxu0 %v672_v11  ;;  %2978 = vmatprep.subr.bf16.mxu1 %v3308_v1  ;;  %v3239_v11 = vld [vmem:[%s4076_s4 + $0x178] sm:$0xff]   ;;  %v1280_v15 = vrot.slane %v1278_v9, 2 }
  0x4b   : > { %2867 = vmatmul.mubr.bf16.gmra.mrb[16].mxu1 %v3499_v31  ;;  %2886 = vmatprep.mubr.msk.bf16.mxu0 %vm3309_vm0, %v3308_v1  ;;  %v569_v31 = vrot.slane %v3249_v27, 3  ;;  %v1474_v12 = vsel %vm587_vm2, %v1472_v17, %v1473_v62  ;;  %v3243_v62 = vld [vmem:[%s4076_s4 + $0x190] sm:$0xff]  }
  0x4c   : > { %2922 = vmatprep.mubr.msk.bf16.mxu1 %vm3309_vm0, %v3308_v1  ;;  %v1281_v16 = vor.u32 %v1280_v15, %v1277_v13 }
  0x4d   : > { %574 = vst [vmem:[#allocation2 + $0x28] sm:$0xe0] %v569_v31  ;;  %v571_v42 = vsel %vm568_vm5, %v569_v31, %v570_v39  ;;  %v3245_v31 = vld [vmem:[%s4076_s4 + $0x198] sm:$0xff]  }
  0x4e   : > { %575 = vst [vmem:[#allocation2 + $0x30] sm:$0x3f] %v571_v42  ;;  %v1290_v19 = vsel %vm1273_vm3, %v1281_v16, %v3583_v0  ;;  %v1301_v0 = vshrl.u32 %v3685_v35, 16 }
  0x52   : > { %2887 = vmatmul.mubr.bf16.vlgmr.msra.gmra.mrb[20].mxu0 %v944_v22  ;;  %v3242_v22 = vld [vmem:[%s4076_s4 + $0x1c0] sm:$0xff]  }
  0x53   : > { %2923 = vmatmul.mubr.bf16.vlgmr.msra.gmra.mrb[20].mxu1 %v1114_v25  ;;  %2943 = vmatpush3.bf16.msra.mxu0 %v3223_v24  ;;  %v3241_v24 = vld [vmem:[%s4076_s4 + $0x188] sm:$0xff]   ;;  %v1304_v25 = vshll.u32 %v3685_v35, 16 }
  0x54   : > { %2944 = vmatprep.subr.bf16.mxu0 %v3308_v1  ;;  %2890 = vmatprep.mubr.msk.bf16.mxu0 %vm3309_vm0, %v3308_v1  ;;  %v3723_v50 = vld [vmem:[#allocation2 + $0x28] sm:$0xff] }
  0x55   : > { %2926 = vmatprep.mubr.msk.bf16.mxu1 %vm3309_vm0, %v3308_v1  ;;  %2979 = vmatpush3.bf16.msra.mxu1 %v3225_v26  ;;  %v2007_v55 = vrot.slane %v3723_v50, 3  ;;  %v1303_v26 = vrot.slane %v1301_v0, 1  ;;  %v1306_v27 = vrot.slane %v1304_v25, 2  ;;  %v1827_v8 = vrot.slane %v1304_v25, 3  ;;  %v3927_v16 = vld [vmem:[#allocation2 + $0x30] sm:$0x7f] }
  0x56   : > { %2980 = vmatprep.subr.bf16.mxu1 %v3308_v1  ;;  %v1647_v17 = vrot.slane %v3723_v50, 2  ;;  %v1619_v25 = vld [vmem:[#allocation2 + $0x30] sm:$0x3f] }
  0x57   : > { %2945 = vmatpush3.bf16.msra.mxu0 %v3224_v28  ;;  %v3749_v60 = vsel %vm568_vm5, %v2005_v56, %v2007_v55  ;;  %v3816_v28 = vld [vmem:[#allocation2 + $0x28] sm:$0x3f]  ;;  %v1807_v56 = vrot.slane %v1805_v52, 2 }
  0x58   : > { %2946 = vmatprep.subr.bf16.mxu0 %v3308_v1  ;;  %v1479_v42 = vrot.slane %v3816_v28, 2 }
  0x59   : > { %2981 = vmatpush3.bf16.msra.mxu1 %v3227_v30  ;;  %v1307_v30 = vor.u32 %v1306_v27, %v1303_v26  ;;  %v1649_v26 = vrot.slane %v1619_v25, 2  ;;  %v3265_v27 = vld [vmem:[%s4076_s4 + $0x228] sm:$0xff]  }
  0x5a   : > { %2891 = vmatmul.mubr.bf16.gmra.mrb[24].mxu0 %v946_v33  ;;  %2982 = vmatprep.subr.bf16.mxu1 %v3308_v1  ;;  %v1313_v33 = vshll.u32 %v3816_v28, 16 }
  0x5b   : > { %2927 = vmatmul.mubr.bf16.gmra.mrb[24].mxu1 %v1116_v34  ;;  %2947 = vmatpush3.bf16.msra.mxu0 %v3226_v32  ;;  %v1310_v32 = vshrl.u32 %v3816_v28, 16 }
  0x5c   : > { %2894 = vmatprep.mubr.msk.bf16.mxu0 %vm3309_vm0, %v3308_v1  ;;  %2930 = vmatprep.mubr.msk.bf16.mxu1 %vm3309_vm0, %v3308_v1 }
  0x5d   : > { %2948 = vmatprep.subr.bf16.mxu0 %v3308_v1  ;;  %2983 = vmatpush3.bf16.msra.mxu1 %v3229_v36  ;;  %v3247_v36 = vld [vmem:[%s4076_s4 + $0x1a0] sm:$0xff]   ;;  %v1312_v37 = vrot.slane %v1310_v32, 1  ;;  %v3267_v32 = vld [vmem:[%s4076_s4 + $0x238] sm:$0xff]  }
  0x5e   : > { %2984 = vmatprep.subr.bf16.mxu1 %v3308_v1 }
  0x5f   : > { %2949 = vmatpush3.bf16.msra.mxu0 %v3228_v38  ;;  %v1315_v38 = vrot.slane %v1313_v33, 2  ;;  %v2009_v33 = vrot.slane %v3927_v16, 3 }
  0x60   : > { %2950 = vmatprep.subr.bf16.mxu0 %v3308_v1 }
  0x61   : > { %2985 = vmatpush3.bf16.msra.mxu1 %v3231_v41  ;;  %v3251_v41 = vld [vmem:[%s4076_s4 + $0x1a8] sm:$0xff]  }
  0x62   : > { %2895 = vmatmul.mubr.bf16.gmra.mrb[28].mxu0 %v1116_v34  ;;  %2986 = vmatprep.subr.bf16.mxu1 %v3308_v1  ;;  %v1308_v34 = vsel %vm1273_vm3, %v3585_v2, %v1307_v30  ;;  %v1316_v2 = vor.u32 %v1315_v38, %v1312_v37 }
  0x63   : > { %2931 = vmatmul.mubr.bf16.gmra.mrb[28].mxu1 %v1118_v48  ;;  %2951 = vmatpush3.bf16.msra.mxu0 %v3230_v45  ;;  %v3254_v48 = vld [vmem:[%s4076_s4 + $0x1f0] sm:$0xff]  }
  0x64   : > { %2898 = vmatprep.mubr.msk.bf16.mxu0 %vm3309_vm0, %v3308_v1  ;;  %2934 = vmatprep.mubr.msk.bf16.mxu1 %vm3309_vm0, %v3308_v1  ;;  %v1317_v44 = vsel %vm1273_vm3, %v1307_v30, %v1316_v2 }
  0x65   : > { %2952 = vmatprep.subr.bf16.mxu0 %v3308_v1  ;;  %2987 = vmatpush3.bf16.msra.mxu1 %v3233_v23  ;;  %v3255_v23 = vld [vmem:[%s4076_s4 + $0x1b8] sm:$0xff]  }
  0x66   : > { %2988 = vmatprep.subr.bf16.mxu1 %v3308_v1 }
  0x67   : > { %2953 = vmatpush3.bf16.msra.mxu0 %v3234_v54  ;;  %v3256_v54 = vld [vmem:[%s4076_s4 + $0x1f8] sm:$0xff]  }
  0x68   : > { %2954 = vmatprep.subr.bf16.mxu0 %v3308_v1 }
  0x69   : > { %2989 = vmatpush3.bf16.msra.mxu1 %v3235_v46 }
  0x6a   : > { %2899 = vmatmul.mubr.bf16.gmra.mrb[32].mxu0 %v950_v61  ;;  %2990 = vmatprep.subr.bf16.mxu1 %v3308_v1  ;;  %v1644_v61 = vsel %vm587_vm2, %v1642_v58, %v3580_v63 }
  0x6b   : > { %2935 = vmatmul.mubr.bf16.gmra.mrb[32].mxu1 %v1120_v3  ;;  %2902 = vmatprep.mubr.msk.bf16.mxu0 %vm3309_vm0, %v3308_v1  ;;  %v3257_v3 = vld [vmem:[%s4076_s4 + $0x200] sm:$0xff]  }
  0x6c   : > { %2938 = vmatprep.mubr.msk.bf16.mxu1 %vm3309_vm0, %v3308_v1  ;;  %2955 = vmatpush3.bf16.msra.mxu0 %v3236_v5 }
  0x6d   : > { %2991 = vmatpush3.bf16.msra.mxu1 %v3237_v7  ;;  %2956 = vmatprep.subr.bf16.mxu0 %v3308_v1  ;;  %v1824_v7 = vrot.slane %v1301_v0, 2 }
  0x6e   : > { %2992 = vmatprep.subr.bf16.mxu1 %v3308_v1 }
  0x6f   : > { %v1828_v9 = vor.u32 %v1827_v8, %v1824_v7 }
  0x70   : > { %2957 = vmatpush3.bf16.msra.mxu0 %v3238_v10  ;;  %v1831_v10 = vshrl.u32 %v3723_v50, 16 }
  0x71   : > { %2993 = vmatpush3.bf16.msra.mxu1 %v3239_v11  ;;  %3014 = vmatprep.subr.bf16.mxu0 %v3308_v1  ;;  %v1834_v11 = vshll.u32 %v3723_v50, 16  ;;  %v1829_v13 = vsel %vm1803_vm6, %v3644_v21, %v1828_v9 }
  0x72   : > { %2903 = vmatmul.mubr.bf16.gmra.mrb[36].mxu0 %v949_v53  ;;  %3050 = vmatprep.subr.bf16.mxu1 %v3308_v1  ;;  %v1808_v53 = vshll.u32 %v1615_v49, 16  ;;  %v1833_v15 = vrot.slane %v1831_v10, 2 }
  0x73   : > { %2939 = vmatmul.mubr.bf16.gmra.mrb[36].mxu1 %v1119_v57  ;;  %2958 = vmatprep.mubr.msk.bf16.mxu0 %vm3309_vm0, %v3308_v1  ;;  %v1836_v14 = vrot.slane %v1834_v11, 3 }
  0x74   : > { %2994 = vmatprep.mubr.msk.bf16.mxu1 %vm3309_vm0, %v3308_v1  ;;  %v1810_v57 = vrot.slane %v1808_v53, 3 }
  0x76   : > { %v1811_v46 = vor.u32 %v1810_v57, %v1807_v56 }
  0x78   : > { %v1820_v5 = vsel %vm1803_vm6, %v1811_v46, %v3644_v21  ;;  %v1837_v21 = vor.u32 %v1836_v14, %v1833_v15 }
  0x7a   : > { %2959 = vmatmul.mubr.bf16.vlgmr.msra.gmra.mrb[40].mxu0 %v1290_v19  ;;  %v3260_v19 = vld [vmem:[%s4076_s4 + $0x218] sm:$0xff]   ;;  %v1838_v0 = vsel %vm1803_vm6, %v1828_v9, %v1837_v21 }
  0x7b   : > { %2995 = vmatmul.mubr.bf16.vlgmr.msra.gmra.mrb[40].mxu1 %v1474_v12  ;;  %3015 = vmatpush3.bf16.msra.mxu0 %v3240_v20  ;;  %v1840_v20 = vshrl.u32 %v3927_v16, 16  ;;  %v1843_v12 = vshll.u32 %v3927_v16, 16 }
  0x7c   : > { %3016 = vmatprep.subr.bf16.mxu0 %v3308_v1  ;;  %2962 = vmatprep.mubr.msk.bf16.mxu0 %vm3309_vm0, %v3308_v1 }
  0x7d   : > { %2998 = vmatprep.mubr.msk.bf16.mxu1 %vm3309_vm0, %v3308_v1  ;;  %3051 = vmatpush3.bf16.msra.mxu1 %v3242_v22 }
  0x7e   : > { %3052 = vmatprep.subr.bf16.mxu1 %v3308_v1 }
  0x7f   : > { %3017 = vmatpush3.bf16.msra.mxu0 %v3241_v24  ;;  %v3261_v24 = vld [vmem:[%s4076_s4 + $0x220] sm:$0xff]  }
  0x80   : > { %3018 = vmatprep.subr.bf16.mxu0 %v3308_v1 }
  0x81   : > { %3053 = vmatpush3.bf16.msra.mxu1 %v3244_v18  ;;  %v1842_v18 = vrot.slane %v1840_v20, 2 }
  0x82   : > { %2963 = vmatmul.mubr.bf16.gmra.mrb[44].mxu0 %v3601_v6  ;;  %3054 = vmatprep.subr.bf16.mxu1 %v3308_v1  ;;  %v3834_v6 = vrot.slane %v3685_v35, 2  ;;  %v3259_v35 = vld [vmem:[%s4076_s4 + $0x210] sm:$0xff]  }
  0x83   : > { %2999 = vmatmul.mubr.bf16.gmra.mrb[44].mxu1 %v3592_v4  ;;  %3019 = vmatpush3.bf16.msra.mxu0 %v3243_v62  ;;  %v3248_v4 = vld [vmem:[%s4076_s4 + $0x1d8] sm:$0xff]   ;;  %v1845_v62 = vrot.slane %v1843_v12, 3 }
  0x84   : > { %2966 = vmatprep.mubr.msk.bf16.mxu0 %vm3309_vm0, %v3308_v1  ;;  %3002 = vmatprep.mubr.msk.bf16.mxu1 %vm3309_vm0, %v3308_v1  ;;  %v3849_v39 = vsel %vm587_vm2, %v3580_v63, %v3834_v6  ;;  %v1480_v45 = vsel %vm587_vm2, %v3834_v6, %v1479_v42  ;;  %v3258_v63 = vld [vmem:[%s4076_s4 + $0x208] sm:$0xff]   ;;  %v1648_v22 = vsel %vm587_vm2, %v3834_v6, %v1647_v17 }
  0x85   : > { %3020 = vmatprep.subr.bf16.mxu0 %v3308_v1  ;;  %3055 = vmatpush3.bf16.msra.mxu1 %v3246_v29  ;;  %v1846_v28 = vor.u32 %v1845_v62, %v1842_v18  ;;  %v1650_v29 = vsel %vm587_vm2, %v1647_v17, %v1649_v26  ;;  %v2010_v6 = vsel %vm568_vm5, %v2007_v55, %v2009_v33 }
  0x86   : > { %3056 = vmatprep.subr.bf16.mxu1 %v3308_v1 }
  0x87   : > { %3021 = vmatpush3.bf16.msra.mxu0 %v3245_v31  ;;  %v1847_v30 = vsel %vm1803_vm6, %v1837_v21, %v1846_v28  ;;  %v3266_v31 = vld [vmem:[%s4076_s4 + $0x230] sm:$0xff]  }
  0x88   : > { %3022 = vmatprep.subr.bf16.mxu0 %v3308_v1 }
  0x89   : > { %3057 = vmatpush3.bf16.msra.mxu1 %v3248_v4 }
  0x8a   : > { %2967 = vmatmul.mubr.bf16.gmra.mrb[48].mxu0 %v1308_v34  ;;  %3058 = vmatprep.subr.bf16.mxu1 %v3308_v1 }
  0x8b   : > { %3003 = vmatmul.mubr.bf16.gmra.mrb[48].mxu1 %v3849_v39  ;;  %3023 = vmatpush3.bf16.msra.mxu0 %v3247_v36 }
  0x8c   : > { %2970 = vmatprep.mubr.msk.bf16.mxu0 %vm3309_vm0, %v3308_v1  ;;  %3006 = vmatprep.mubr.msk.bf16.mxu1 %vm3309_vm0, %v3308_v1 }
  0x8d   : > { %3024 = vmatprep.subr.bf16.mxu0 %v3308_v1  ;;  %3059 = vmatpush3.bf16.msra.mxu1 %v3250_v40 }
  0x8e   : > { %3060 = vmatprep.subr.bf16.mxu1 %v3308_v1 }
  0x8f   : > { %3025 = vmatpush3.bf16.msra.mxu0 %v3251_v41 }
  0x90   : > { %3026 = vmatprep.subr.bf16.mxu0 %v3308_v1 }
  0x91   : > { %3061 = vmatpush3.bf16.msra.mxu1 %v3252_v43 }
  0x92   : > { %2971 = vmatmul.mubr.bf16.gmra.mrb[52].mxu0 %v1317_v44  ;;  %3062 = vmatprep.subr.bf16.mxu1 %v3308_v1 }
  0x93   : > { %3007 = vmatmul.mubr.bf16.gmra.mrb[52].mxu1 %v1480_v45  ;;  %2974 = vmatprep.mubr.msk.bf16.mxu0 %vm3309_vm0, %v3308_v1 }
  0x94   : > { %3010 = vmatprep.mubr.msk.bf16.mxu1 %vm3309_vm0, %v3308_v1  ;;  %3027 = vmatpush3.bf16.msra.mxu0 %v3253_v47 }
  0x95   : > { %3063 = vmatpush3.bf16.msra.mxu1 %v3254_v48  ;;  %3028 = vmatprep.subr.bf16.mxu0 %v3308_v1 }
  0x96   : > { %3064 = vmatprep.subr.bf16.mxu1 %v3308_v1 }
  0x98   : > { %3029 = vmatpush3.bf16.msra.mxu0 %v3255_v23 }
  0x99   : > { %3065 = vmatpush3.bf16.msra.mxu1 %v3256_v54  ;;  %3086 = vmatprep.subr.bf16.mxu0 %v3308_v1 }
  0x9a   : > { %2975 = vmatmul.mubr.bf16.gmra.mrb[56].mxu0 %v1316_v2  ;;  %3122 = vmatprep.subr.bf16.mxu1 %v3308_v1 }
  0x9b   : > { %3011 = vmatmul.mubr.bf16.gmra.mrb[56].mxu1 %v1479_v42  ;;  %3030 = vmatprep.mubr.msk.bf16.mxu0 %vm3309_vm0, %v3308_v1 }
  0x9c   : > { %3066 = vmatprep.mubr.msk.bf16.mxu1 %vm3309_vm0, %v3308_v1 }
  0xa2   : > { %3031 = vmatmul.mubr.bf16.vlgmr.msra.gmra.mrb[60].mxu0 %v1644_v61 }
  0xa3   : > { %3067 = vmatmul.mubr.bf16.vlgmr.msra.gmra.mrb[60].mxu1 %v1820_v5  ;;  %3087 = vmatpush3.bf16.msra.mxu0 %v3257_v3 }
  0xa4   : > { %3088 = vmatprep.subr.bf16.mxu0 %v3308_v1  ;;  %3034 = vmatprep.mubr.msk.bf16.mxu0 %vm3309_vm0, %v3308_v1 }
  0xa5   : > { %3070 = vmatprep.mubr.msk.bf16.mxu1 %vm3309_vm0, %v3308_v1  ;;  %3130 = vmatpush3.bf16.msra.mxu1 %v3257_v3 }
  0xa6   : > { %3123 = vmatprep.subr.bf16.mxu1 %v3308_v1 }
  0xa7   : > { %3089 = vmatpush3.bf16.msra.mxu0 %v3258_v63 }
  0xa8   : > { %3090 = vmatprep.subr.bf16.mxu0 %v3308_v1 }
  0xa9   : > { %3131 = vmatpush3.bf16.msra.mxu1 %v3258_v63 }
  0xaa   : > { %3035 = vmatmul.mubr.bf16.gmra.mrb[64].mxu0 %v3849_v39  ;;  %3124 = vmatprep.subr.bf16.mxu1 %v3308_v1 }
  0xab   : > { %3071 = vmatmul.mubr.bf16.gmra.mrb[64].mxu1 %v1829_v13  ;;  %3091 = vmatpush3.bf16.msra.mxu0 %v3259_v35 }
  0xac   : > { %3038 = vmatprep.mubr.msk.bf16.mxu0 %vm3309_vm0, %v3308_v1  ;;  %3074 = vmatprep.mubr.msk.bf16.mxu1 %vm3309_vm0, %v3308_v1 }
  0xad   : > { %3092 = vmatprep.subr.bf16.mxu0 %v3308_v1  ;;  %3132 = vmatpush3.bf16.msra.mxu1 %v3259_v35 }
  0xae   : > { %3125 = vmatprep.subr.bf16.mxu1 %v3308_v1 }
  0xaf   : > { %3093 = vmatpush3.bf16.msra.mxu0 %v3260_v19 }
  0xb0   : > { %3094 = vmatprep.subr.bf16.mxu0 %v3308_v1 }
  0xb1   : > { %3133 = vmatpush3.bf16.msra.mxu1 %v3260_v19 }
  0xb2   : > { %3039 = vmatmul.mubr.bf16.gmra.mrb[68].mxu0 %v1648_v22  ;;  %3126 = vmatprep.subr.bf16.mxu1 %v3308_v1 }
  0xb3   : > { %3075 = vmatmul.mubr.bf16.gmra.mrb[68].mxu1 %v1838_v0  ;;  %3095 = vmatpush3.bf16.msra.mxu0 %v3261_v24 }
  0xb4   : > { %3042 = vmatprep.mubr.msk.bf16.mxu0 %vm3309_vm0, %v3308_v1  ;;  %3078 = vmatprep.mubr.msk.bf16.mxu1 %vm3309_vm0, %v3308_v1 }
  0xb5   : > { %3134 = vmatpush3.bf16.msra.mxu1 %v3261_v24  ;;  %3096 = vmatprep.subr.bf16.mxu0 %v3308_v1 }
  0xb6   : > { %3127 = vmatprep.subr.bf16.mxu1 %v3308_v1 }
  0xb7   : > { %3097 = vmatpush3.bf16.msra.mxu0 %v3265_v27 }
  0xb8   : > { %3098 = vmatprep.subr.bf16.mxu0 %v3308_v1 }
  0xb9   : > { %3135 = vmatpush3.bf16.msra.mxu1 %v3265_v27 }
  0xba   : > { %3043 = vmatmul.mubr.bf16.gmra.mrb[72].mxu0 %v1650_v29  ;;  %3128 = vmatprep.subr.bf16.mxu1 %v3308_v1 }
  0xbb   : > { %3079 = vmatmul.mubr.bf16.gmra.mrb[72].mxu1 %v1847_v30  ;;  %3046 = vmatprep.mubr.msk.bf16.mxu0 %vm3309_vm0, %v3308_v1 }
  0xbc   : > { %3082 = vmatprep.mubr.msk.bf16.mxu1 %vm3309_vm0, %v3308_v1  ;;  %3099 = vmatpush3.bf16.msra.mxu0 %v3266_v31 }
  0xbd   : > { %3136 = vmatpush3.bf16.msra.mxu1 %v3266_v31  ;;  %3100 = vmatprep.subr.bf16.mxu0 %v3308_v1 }
  0xbe   : > { %3129 = vmatprep.subr.bf16.mxu1 %v3308_v1 }
  0xc0   : > { %3101 = vmatpush3.bf16.msra.mxu0 %v3267_v32 }
  0xc1   : > { %3137 = vmatpush3.bf16.msra.mxu1 %v3267_v32 }
  0xc2   : > { %3047 = vmatmul.mubr.bf16.gmra.mrb[76].mxu0 %v1649_v26 }
  0xc3   : > { %3083 = vmatmul.mubr.bf16.gmra.mrb[76].mxu1 %v1846_v28  ;;  %3102 = vmatprep.mubr.msk.bf16.mxu0 %vm3309_vm0, %v3308_v1 }
  0xc4   : > { %3114 = vmatprep.mubr.msk.bf16.mxu1 %vm3309_vm0, %v3308_v1 }
  0xca   : > { %3103 = vmatmul.mubr.bf16.vlgmr.msra.gmra.mrb[80].mxu0 %v3726_v51 }
  0xcb   : > { %3115 = vmatmul.mubr.bf16.vlgmr.msra.gmra.mrb[80].mxu1 %v2010_v6  ;;  %3106 = vmatprep.mubr.msk.bf16.mxu0 %vm3309_vm0, %v3308_v1 }
  0xcc   : > { %3118 = vmatprep.mubr.msk.bf16.mxu1 %vm3309_vm0, %v3308_v1 }
  0xd2   : > { %3107 = vmatmul.mubr.bf16.gmra.mrb[84].mxu0 %v3744_v59 }
  0xd3   : > { %3119 = vmatmul.mubr.bf16.gmra.mrb[84].mxu1 %v2009_v33  ;;  %3110 = vmatprep.mubr.msk.bf16.mxu0 %vm3309_vm0, %v3308_v1 }
  0xda   : > { %3111 = vmatmul.mubr.bf16.gmra.mrb[88].mxu0 %v3749_v60 }
  0xfd   : > { %v760_v50 = vpop.f32.mrb[0].mxu0 }
  0xfe   : > { %v880_v4 = vpop.f32.mrb[0].mxu1  ;;  %v2816_v55 = vpop.f32.mrb[1].mxu0 }
  0xff   : > { %v881_v34 = vadd.f32 %v880_v4, %v760_v50  ;;  %v2852_v51 = vpop.f32.mrb[1].mxu1  ;;  %v763_v36 = vpop.f32.mrb[2].mxu0 }
 0x100   : > { %v883_v37 = vpop.f32.mrb[2].mxu1  ;;  %v2817_v38 = vpop.f32.mrb[3].mxu0 }
 0x101   : > { %v884_v39 = vadd.f32 %v883_v37, %v763_v36  ;;  %v2853_v40 = vpop.f32.mrb[3].mxu1 }
 0x105   : > { %v768_v2 = vpop.f32.mrb[4].mxu0 }
 0x106   : > { %v888_v41 = vpop.f32.mrb[4].mxu1  ;;  %v2820_v42 = vpop.f32.mrb[5].mxu0 }
 0x107   : > { %v889_v59 = vadd.f32 %v888_v41, %v768_v2  ;;  %v2856_v43 = vpop.f32.mrb[5].mxu1  ;;  %v771_v44 = vpop.f32.mrb[6].mxu0 }
 0x108   : > { %v891_v45 = vpop.f32.mrb[6].mxu1  ;;  %v2821_v1 = vpop.f32.mrb[7].mxu0 }
 0x109   : > { %v892_v47 = vadd.f32 %v891_v45, %v771_v44  ;;  %v2857_v60 = vpop.f32.mrb[7].mxu1 }
 0x10d   : > { %v776_v48 = vpop.f32.mrb[8].mxu0 }
 0x10e   : > { %v896_v49 = vpop.f32.mrb[8].mxu1  ;;  %v2824_v23 = vpop.f32.mrb[9].mxu0 }
 0x10f   : > { %v897_v52 = vadd.f32 %v896_v49, %v776_v48  ;;  %v2860_v53 = vpop.f32.mrb[9].mxu1  ;;  %v779_v54 = vpop.f32.mrb[10].mxu0 }
 0x110   : > { %v899_v56 = vpop.f32.mrb[10].mxu1  ;;  %v2825_v57 = vpop.f32.mrb[11].mxu0 }
 0x111   : > { %v900_v58 = vadd.f32 %v899_v56, %v779_v54  ;;  %v2861_v46 = vpop.f32.mrb[11].mxu1 }
 0x115   : > { %v784_v61 = vpop.f32.mrb[12].mxu0 }
 0x116   : > { %v904_v3 = vpop.f32.mrb[12].mxu1  ;;  %v2828_v5 = vpop.f32.mrb[13].mxu0 }
 0x117   : > { %v905_v7 = vadd.f32 %v904_v3, %v784_v61  ;;  %v2864_v8 = vpop.f32.mrb[13].mxu1  ;;  %v787_v63 = vpop.f32.mrb[14].mxu0 }
 0x118   : > { %v907_v9 = vpop.f32.mrb[14].mxu1  ;;  %v2829_v10 = vpop.f32.mrb[15].mxu0 }
 0x119   : > { %v908_v11 = vadd.f32 %v907_v9, %v787_v63  ;;  %v2865_v35 = vpop.f32.mrb[15].mxu1 }
 0x11d   : > { %v792_v13 = vpop.f32.mrb[16].mxu0 }
 0x11e   : > { %v2832_v15 = vpop.f32.mrb[17].mxu0  ;;  %v912_v14 = vpop.f32.mrb[16].mxu1 }
 0x11f   : > { %v913_v16 = vadd.f32 %v912_v14, %v792_v13  ;;  %v795_v17 = vpop.f32.mrb[18].mxu0  ;;  %v2868_v19 = vpop.f32.mrb[17].mxu1 }
 0x120   : > { %v2833_v21 = vpop.f32.mrb[19].mxu0  ;;  %v915_v20 = vpop.f32.mrb[18].mxu1 }
 0x121   : > { %v2869_v12 = vpop.f32.mrb[19].mxu1 }
 0x125   : > { %v1038_v22 = vpop.f32.mrb[20].mxu0 }
 0x126   : > { %v1076_v24 = vadd.f32 %v1038_v22, %v881_v34  ;;  %v2888_v0 = vpop.f32.mrb[21].mxu0  ;;  %v1208_v25 = vpop.f32.mrb[20].mxu1 }
 0x127   : > { %v1041_v18 = vpop.f32.mrb[22].mxu0  ;;  %v2924_v62 = vpop.f32.mrb[21].mxu1 }
 0x128   : > { %v1077_v26 = vadd.f32 %v1041_v18, %v884_v39  ;;  %v1246_v27 = vadd.f32 %v1208_v25, %v1076_v24  ;;  %v2889_v28 = vpop.f32.mrb[23].mxu0  ;;  %v1211_v29 = vpop.f32.mrb[22].mxu1 }
 0x129   : > { %v2925_v30 = vpop.f32.mrb[23].mxu1 }
 0x12a   : > { %v1247_v31 = vadd.f32 %v1211_v29, %v1077_v26 }
 0x12d   : > { %v1046_v32 = vpop.f32.mrb[24].mxu0 }
 0x12e   : > { %v1078_v33 = vadd.f32 %v1046_v32, %v889_v59  ;;  %v2892_v6 = vpop.f32.mrb[25].mxu0  ;;  %v1216_v50 = vpop.f32.mrb[24].mxu1 }
 0x12f   : > { %v1049_v4 = vpop.f32.mrb[26].mxu0  ;;  %v2928_v55 = vpop.f32.mrb[25].mxu1 }
 0x130   : > { %v1079_v51 = vadd.f32 %v1049_v4, %v892_v47  ;;  %v1248_v36 = vadd.f32 %v1216_v50, %v1078_v33  ;;  %v2893_v37 = vpop.f32.mrb[27].mxu0  ;;  %v1219_v34 = vpop.f32.mrb[26].mxu1 }
 0x131   : > { %v2929_v38 = vpop.f32.mrb[27].mxu1 }
 0x132   : > { %v1249_v40 = vadd.f32 %v1219_v34, %v1079_v51 }
 0x135   : > { %v1054_v2 = vpop.f32.mrb[28].mxu0 }
 0x136   : > { %v1080_v41 = vadd.f32 %v1054_v2, %v897_v52  ;;  %v2896_v39 = vpop.f32.mrb[29].mxu0  ;;  %v1224_v42 = vpop.f32.mrb[28].mxu1 }
 0x137   : > { %v1057_v43 = vpop.f32.mrb[30].mxu0  ;;  %v2932_v44 = vpop.f32.mrb[29].mxu1 }
 0x138   : > { %v1081_v45 = vadd.f32 %v1057_v43, %v900_v58  ;;  %v1250_v1 = vadd.f32 %v1224_v42, %v1080_v41  ;;  %v2897_v60 = vpop.f32.mrb[31].mxu0  ;;  %v1227_v59 = vpop.f32.mrb[30].mxu1 }
 0x139   : > { %v2933_v48 = vpop.f32.mrb[31].mxu1 }
 0x13a   : > { %v1251_v49 = vadd.f32 %v1227_v59, %v1081_v45 }
 0x13d   : > { %v1062_v23 = vpop.f32.mrb[32].mxu0 }
 0x13e   : > { %v1082_v53 = vadd.f32 %v1062_v23, %v905_v7  ;;  %v2900_v47 = vpop.f32.mrb[33].mxu0  ;;  %v1232_v54 = vpop.f32.mrb[32].mxu1 }
 0x13f   : > { %v1065_v56 = vpop.f32.mrb[34].mxu0  ;;  %v2936_v57 = vpop.f32.mrb[33].mxu1 }
 0x140   : > { %v1083_v46 = vadd.f32 %v1065_v56, %v908_v11  ;;  %v1252_v61 = vadd.f32 %v1232_v54, %v1082_v53  ;;  %v2901_v3 = vpop.f32.mrb[35].mxu0  ;;  %v1235_v52 = vpop.f32.mrb[34].mxu1 }
 0x141   : > { %v2937_v5 = vpop.f32.mrb[35].mxu1 }
 0x142   : > { %v1253_v8 = vadd.f32 %v1235_v52, %v1083_v46 }
 0x145   : > { %v1070_v63 = vpop.f32.mrb[36].mxu0 }
 0x146   : > { %v1084_v9 = vadd.f32 %v1070_v63, %v913_v16  ;;  %v2904_v58 = vpop.f32.mrb[37].mxu0  ;;  %v1240_v10 = vpop.f32.mrb[36].mxu1 }
 0x147   : > { %v1073_v35 = vpop.f32.mrb[38].mxu0  ;;  %v2940_v13 = vpop.f32.mrb[37].mxu1 }
 0x148   : > { %v1254_v15 = vadd.f32 %v1240_v10, %v1084_v9  ;;  %v2905_v14 = vpop.f32.mrb[39].mxu0  ;;  %v1243_v17 = vpop.f32.mrb[38].mxu1 }
 0x149   : > { %v2941_v7 = vpop.f32.mrb[39].mxu1 }
 0x14d   : > { %v1405_v19 = vpop.f32.mrb[40].mxu0 }
 0x14e   : > { %v1443_v21 = vadd.f32 %v1405_v19, %v1246_v27  ;;  %v2960_v20 = vpop.f32.mrb[41].mxu0  ;;  %v1568_v12 = vpop.f32.mrb[40].mxu1 }
 0x14f   : > { %v1408_v11 = vpop.f32.mrb[42].mxu0  ;;  %v2996_v22 = vpop.f32.mrb[41].mxu1 }
 0x150   : > { %v1444_v24 = vadd.f32 %v1408_v11, %v1247_v31  ;;  %v1606_v0 = vadd.f32 %v1568_v12, %v1443_v21  ;;  %v2961_v25 = vpop.f32.mrb[43].mxu0  ;;  %v1571_v18 = vpop.f32.mrb[42].mxu1 }
 0x151   : > { %v2997_v62 = vpop.f32.mrb[43].mxu1 }
 0x152   : > { %v1607_v16 = vadd.f32 %v1571_v18, %v1444_v24 }
 0x155   : > { %v1413_v26 = vpop.f32.mrb[44].mxu0 }
 0x156   : > { %v1445_v28 = vadd.f32 %v1413_v26, %v1248_v36  ;;  %v2964_v29 = vpop.f32.mrb[45].mxu0  ;;  %v1576_v30 = vpop.f32.mrb[44].mxu1 }
 0x157   : > { %v1416_v32 = vpop.f32.mrb[46].mxu0  ;;  %v3000_v33 = vpop.f32.mrb[45].mxu1 }
 0x158   : > { %v1446_v6 = vadd.f32 %v1416_v32, %v1249_v40  ;;  %v1608_v50 = vadd.f32 %v1576_v30, %v1445_v28  ;;  %v2965_v4 = vpop.f32.mrb[47].mxu0  ;;  %v1579_v27 = vpop.f32.mrb[46].mxu1 }
 0x159   : > { %v3001_v55 = vpop.f32.mrb[47].mxu1 }
 0x15a   : > { %v1609_v51 = vadd.f32 %v1579_v27, %v1446_v6 }
 0x15d   : > { %v1421_v37 = vpop.f32.mrb[48].mxu0 }
 0x15e   : > { %v1447_v34 = vadd.f32 %v1421_v37, %v1250_v1  ;;  %v2968_v31 = vpop.f32.mrb[49].mxu0  ;;  %v1584_v38 = vpop.f32.mrb[48].mxu1 }
 0x15f   : > { %v1424_v2 = vpop.f32.mrb[50].mxu0  ;;  %v3004_v41 = vpop.f32.mrb[49].mxu1 }
 0x160   : > { %v1448_v39 = vadd.f32 %v1424_v2, %v1251_v49  ;;  %v1610_v42 = vadd.f32 %v1584_v38, %v1447_v34  ;;  %v2969_v43 = vpop.f32.mrb[51].mxu0  ;;  %v1587_v36 = vpop.f32.mrb[50].mxu1 }
 0x161   : > { %v3005_v44 = vpop.f32.mrb[51].mxu1 }
 0x162   : > { %v1611_v45 = vadd.f32 %v1587_v36, %v1448_v39 }
 0x165   : > { %v1429_v60 = vpop.f32.mrb[52].mxu0 }
 0x166   : > { %v1449_v59 = vadd.f32 %v1429_v60, %v1252_v61  ;;  %v2972_v40 = vpop.f32.mrb[53].mxu0  ;;  %v1592_v48 = vpop.f32.mrb[52].mxu1 }
 0x167   : > { %v1432_v23 = vpop.f32.mrb[54].mxu0  ;;  %v3008_v53 = vpop.f32.mrb[53].mxu1 }
 0x168   : > { %v1450_v47 = vadd.f32 %v1432_v23, %v1253_v8  ;;  %v1612_v54 = vadd.f32 %v1592_v48, %v1449_v59  ;;  %v2973_v56 = vpop.f32.mrb[55].mxu0  ;;  %v1595_v1 = vpop.f32.mrb[54].mxu1  ;;  %v2147_v53 = vlaneseq }
 0x169   : > { %v3009_v57 = vpop.f32.mrb[55].mxu1 }
 0x16a   : > { %v1613_v46 = vadd.f32 %v1595_v1, %v1450_v47  ;;  %v2148_v56 = vshrl.u32 %v2147_v53, 7 }
 0x16d   : > { %v1437_v3 = vpop.f32.mrb[56].mxu0 }
 0x16e   : > { %v1451_v52 = vadd.f32 %v1437_v3, %v1254_v15  ;;  %v2976_v49 = vpop.f32.mrb[57].mxu0  ;;  %v1600_v5 = vpop.f32.mrb[56].mxu1 }
 0x16f   : > { %v1440_v63 = vpop.f32.mrb[58].mxu0  ;;  %v3012_v9 = vpop.f32.mrb[57].mxu1 }
 0x170   : > { %v1614_v58 = vadd.f32 %v1600_v5, %v1451_v52  ;;  %v2977_v10 = vpop.f32.mrb[59].mxu0  ;;  %v1603_v35 = vpop.f32.mrb[58].mxu1 }
 0x171   : > { %v3013_v61 = vpop.f32.mrb[59].mxu1  ;;  %v2149_v35 = vsub.s32 0, %v2148_v56 }
 0x175   : > { %v1738_v13 = vpop.f32.mrb[60].mxu0 }
 0x176   : > { %v1776_v14 = vadd.f32 %v1738_v13, %v1606_v0  ;;  %v3032_v17 = vpop.f32.mrb[61].mxu0  ;;  %v1935_v7 = vpop.f32.mrb[60].mxu1 }
 0x177   : > { %v1741_v8 = vpop.f32.mrb[62].mxu0  ;;  %v3068_v19 = vpop.f32.mrb[61].mxu1 }
 0x178   : > { %v1777_v21 = vadd.f32 %v1741_v8, %v1607_v16  ;;  %v1973_v20 = vadd.f32 %v1935_v7, %v1776_v14  ;;  %v3033_v12 = vpop.f32.mrb[63].mxu0  ;;  %v1938_v11 = vpop.f32.mrb[62].mxu1 }
 0x179   : > { %v3069_v22 = vpop.f32.mrb[63].mxu1 }
 0x17a   : > { %v3993_v15 = vadd.f32 %v1938_v11, %v1777_v21 }
 0x17d   : > { %v1746_v24 = vpop.f32.mrb[64].mxu0 }
 0x17e   : > { %v1778_v25 = vadd.f32 %v1746_v24, %v1608_v50  ;;  %v3036_v18 = vpop.f32.mrb[65].mxu0  ;;  %v1943_v62 = vpop.f32.mrb[64].mxu1 }
 0x17f   : > { %v1749_v26 = vpop.f32.mrb[66].mxu0  ;;  %v3072_v28 = vpop.f32.mrb[65].mxu1 }
 0x180   : > { %v1779_v29 = vadd.f32 %v1749_v26, %v1609_v51  ;;  %v3995_v30 = vadd.f32 %v1943_v62, %v1778_v25  ;;  %v3037_v0 = vpop.f32.mrb[67].mxu0  ;;  %v1946_v32 = vpop.f32.mrb[66].mxu1 }
 0x181   : > { %v3073_v33 = vpop.f32.mrb[67].mxu1 }
 0x182   : > { %v3997_v6 = vadd.f32 %v1946_v32, %v1779_v29 }
 0x185   : > { %v1754_v16 = vpop.f32.mrb[68].mxu0 }
 0x186   : > { %v1780_v4 = vadd.f32 %v1754_v16, %v1610_v42  ;;  %v3040_v27 = vpop.f32.mrb[69].mxu0  ;;  %v1951_v55 = vpop.f32.mrb[68].mxu1 }
 0x187   : > { %v1757_v37 = vpop.f32.mrb[70].mxu0  ;;  %v3076_v34 = vpop.f32.mrb[69].mxu1 }
 0x188   : > { %v1781_v31 = vadd.f32 %v1757_v37, %v1611_v45  ;;  %v3999_v50 = vadd.f32 %v1951_v55, %v1780_v4  ;;  %v3041_v38 = vpop.f32.mrb[71].mxu0  ;;  %v1954_v2 = vpop.f32.mrb[70].mxu1 }
 0x189   : > { %v3077_v41 = vpop.f32.mrb[71].mxu1 }
 0x18a   : > { %v4001_v51 = vadd.f32 %v1954_v2, %v1781_v31 }
 0x18d   : > { %v1762_v39 = vpop.f32.mrb[72].mxu0 }
 0x18e   : > { %v1782_v43 = vadd.f32 %v1762_v39, %v1612_v54  ;;  %v3044_v36 = vpop.f32.mrb[73].mxu0  ;;  %v1959_v44 = vpop.f32.mrb[72].mxu1  ;;  %v2145_v54 = vld [vmem:[%s4077_s5] sm:$0x1] }
 0x18f   : > { %v1765_v60 = vpop.f32.mrb[74].mxu0  ;;  %v3080_v59 = vpop.f32.mrb[73].mxu1  ;;  %v2146_v10 = vunpack.c.l.bf16 %v2145_v54 }
 0x190   : > { %v1783_v42 = vadd.f32 %v1765_v60, %v1613_v46  ;;  %v1979_v40 = vadd.f32 %v1959_v44, %v1782_v43  ;;  %v3045_v48 = vpop.f32.mrb[75].mxu0  ;;  %v1962_v23 = vpop.f32.mrb[74].mxu1 }
 0x191   : > { %v3081_v45 = vpop.f32.mrb[75].mxu1  ;;  %v4008_v13 = vrot.slane %v2146_v10, %v2149_v35 }
 0x192   : > { %v1980_v47 = vadd.f32 %v1962_v23, %v1783_v42 }
 0x195   : > { %v1770_v1 = vpop.f32.mrb[76].mxu0 }
 0x196   : > { %v1784_v57 = vadd.f32 %v1770_v1, %v1614_v58  ;;  %v3048_v3 = vpop.f32.mrb[77].mxu0  ;;  %v1967_v52 = vpop.f32.mrb[76].mxu1 }
 0x197   : > { %v1773_v49 = vpop.f32.mrb[78].mxu0  ;;  %v3084_v46 = vpop.f32.mrb[77].mxu1 }
 0x198   : > { %v1981_v5 = vadd.f32 %v1967_v52, %v1784_v57  ;;  %v3049_v63 = vpop.f32.mrb[79].mxu0  ;;  %v1970_v9 = vpop.f32.mrb[78].mxu1 }
 0x199   : > { %v3085_v61 = vpop.f32.mrb[79].mxu1 }
 0x19d   : > { %v2098_v14 = vpop.f32.mrb[80].mxu0 }
 0x19e   : > { %v2136_v17 = vadd.f32 %v2098_v14, %v1973_v20  ;;  %v2122_v7 = vpop.f32.mrb[80].mxu1  ;;  %v3104_v8 = vpop.f32.mrb[81].mxu0 }
 0x19f   : > { %v2142_v58 = vadd.f32 %v2122_v7, %v1979_v40  ;;  %v3116_v19 = vpop.f32.mrb[81].mxu1  ;;  %v2101_v21 = vpop.f32.mrb[82].mxu0 }
 0x1a0   : > { %v2151_v12 = vadd.f32 %v4008_v13, %v2136_v17  ;;  %v2137_v11 = vadd.f32 %v2101_v21, %v3993_v15  ;;  %v2125_v22 = vpop.f32.mrb[82].mxu1  ;;  %v3105_v24 = vpop.f32.mrb[83].mxu0 }
 0x1a1   : > { %v2157_v25 = vadd.f32 %v4008_v13, %v2142_v58  ;;  %v2143_v18 = vadd.f32 %v2125_v22, %v1980_v47  ;;  %v3117_v62 = vpop.f32.mrb[83].mxu1 }
 0x1a2   : > { %v2152_v26 = vadd.f32 %v4008_v13, %v2137_v11  ;;  %v2160_v29 = vmax.f32 %v2151_v12, 0.0 }
 0x1a3   : > { %v2166_v20 = vmax.f32 %v2157_v25, 0.0  ;;  %v2158_v28 = vadd.f32 %v4008_v13, %v2143_v18 }
 0x1a4   : > { %v2161_v0 = vmax.f32 %v2152_v26, 0.0 }
 0x1a5   : > { %v4016_v32 = vpack.c.bf16 %v2166_v20, %v2166_v20  ;;  %v2167_v15 = vmax.f32 %v2158_v28, 0.0  ;;  %v2106_v33 = vpop.f32.mrb[84].mxu0 }
 0x1a6   : > { %v2679_v16 = vpack.c.bf16 %v2161_v0, %v2160_v29  ;;  %v2138_v4 = vadd.f32 %v2106_v33, %v3995_v30  ;;  %v2130_v27 = vpop.f32.mrb[84].mxu1  ;;  %v3108_v55 = vpop.f32.mrb[85].mxu0 }
 0x1a7   : > { %v2674_v37 = vpack.c.bf16 %v2167_v15, %v2167_v15  ;;  %v2144_v34 = vadd.f32 %v2130_v27, %v1981_v5  ;;  %v2109_v31 = vpop.f32.mrb[86].mxu0  ;;  %v3120_v38 = vpop.f32.mrb[85].mxu1  ;;  %v2662_v30 = vrot.slane %v4016_v32, 11  ;;  %v2219_v11 = vrot.slane %v4016_v32, 6 }
 0x1a8   : > { %2680 = vst [vmem:[%s4021_s8] sm:$0xff] %v2679_v16   ;;  %v2153_v41 = vadd.f32 %v4008_v13, %v2138_v4  ;;  %v2139_v39 = vadd.f32 %v2109_v31, %v3997_v6  ;;  %v3109_v43 = vpop.f32.mrb[87].mxu0  ;;  %v2133_v36 = vpop.f32.mrb[86].mxu1 }
 0x1a9   : > { %v2236_v44 = vrot.slane %v2674_v37, 7  ;;  %v2159_v60 = vadd.f32 %v4008_v13, %v2144_v34  ;;  %v3121_v59 = vpop.f32.mrb[87].mxu1 }
 0x1aa   : > { %v2162_v42 = vmax.f32 %v2153_v41, 0.0  ;;  %v2154_v40 = vadd.f32 %v4008_v13, %v2139_v39 }
 0x1ab   : > { %v2237_v48 = vsel %vm4025_vm9, %v2662_v30, %v2236_v44  ;;  %v2168_v23 = vmax.f32 %v2159_v60, 0.0  ;;  %v2238_v57 = vrot.slane %v2236_v44, 4 }
 0x1ac   : > { %2663 = vst [vmem:[%s4021_s8 + $0x18] sm:$0xf] %v2237_v48  ;;  %v2669_v53 = vpack.c.bf16 %v2162_v42, %v2162_v42  ;;  %v2163_v45 = vmax.f32 %v2154_v40, 0.0 }
 0x1ad   : > { %v2675_v6 = vpack.c.bf16 %v2168_v23, %v2168_v23  ;;  %v2114_v47 = vpop.f32.mrb[88].mxu0 }
 0x1ae   : > { %v2670_v56 = vpack.c.bf16 %v2163_v45, %v2163_v45  ;;  %v2140_v1 = vadd.f32 %v2114_v47, %v3999_v50  ;;  %v3112_v54 = vpop.f32.mrb[89].mxu0  ;;  %v2652_v46 = vrot.slane %v2669_v53, 9 }
 0x1af   : > { %v2239_v3 = vrot.slane %v2675_v6, 7  ;;  %v2117_v49 = vpop.f32.mrb[90].mxu0 }
 0x1b0   : > { %v2196_v5 = vrot.slane %v2670_v56, 5  ;;  %v2155_v63 = vadd.f32 %v4008_v13, %v2140_v1  ;;  %v2141_v9 = vadd.f32 %v2117_v49, %v4001_v51  ;;  %v3113_v10 = vpop.f32.mrb[91].mxu0 }
 0x1b1   : > { %v2240_v35 = vsel %vm4025_vm9, %v2238_v57, %v2239_v3 }
 0x1b2   : > { %2664 = vst [vmem:[%s4021_s8 + $0x1c] sm:$0xf] %v2240_v35  ;;  %v2197_v50 = vsel %vm4038_vm12, %v2652_v46, %v2196_v5  ;;  %v2164_v61 = vmax.f32 %v2155_v63, 0.0  ;;  %v2156_v14 = vadd.f32 %v4008_v13, %v2141_v9  ;;  %v2198_v51 = vrot.slane %v2196_v5, 4 }
 0x1b3   : > { %2653 = vst [vmem:[%s4021_s8 + $0x8] sm:$0xf] %v2197_v50 }
 0x1b4   : > { %v2671_v17 = vpack.c.bf16 %v2164_v61, %v2164_v61  ;;  %v2165_v7 = vmax.f32 %v2156_v14, 0.0 }
 0x1b6   : > { %v2199_v8 = vrot.slane %v2671_v17, 5  ;;  %v2672_v58 = vpack.c.bf16 %v2165_v7, %v2165_v7  ;;  %v2657_v21 = vrot.slane %v2671_v17, 10 }
 0x1b8   : > { %v2200_v19 = vsel %vm4038_vm12, %v2198_v51, %v2199_v8  ;;  %v2216_v12 = vrot.slane %v2672_v58, 6 }
 0x1b9   : > { %2654 = vst [vmem:[%s4021_s8 + $0xc] sm:$0xf] %v2200_v19 }
 0x1ba   : > { %v2217_v13 = vsel %vm2213_vm15, %v2657_v21, %v2216_v12  ;;  %v2218_v22 = vrot.slane %v2216_v12, 4 }
 0x1bb   : > { %2658 = vst [vmem:[%s4021_s8 + $0x10] sm:$0xf] %v2217_v13 }
 0x1bc   : > { %v2220_v24 = vsel %vm2213_vm15, %v2218_v22, %v2219_v11 }
 0x1bd   : > { %2659 = vst [vmem:[%s4021_s8 + $0x14] sm:$0xf] %v2220_v24 }
 0x1be PF: > { %s16_s25 = sadd.s32 1, %s3306_s25   ;;  %s4086_s21 = smov %s3298_s23 }
 0x1bf   : > { %p13_p11 = scmp.ge.s32.totalorder %s16_s25, 10   ;;  %s4087_s22 = smov %s3302_s24 }
 0x1c0   : > { %s4088_s23 = smov %s4091_s26  ;;  %s4089_s24 = smov %s4095_s27 }
 0x1c1   :  { %15 = sbr.rel (!%p13_p11) target bundleno = 3 (0x3), region = 94 }

</bundles_post_ra>
